<compile_context>
chip_gen: v7x
topology: tpu7x:2x2x1
jax: 0.10.0
libtpu: 0.0.40
codegen_flags: <defaults>
</compile_context>

<pallas_src>
import jax
import jax.numpy as jnp
from jax.experimental import pallas as pl
from jax.experimental.pallas import tpu as pltpu

NUM_FEATURES = 21
OUTPUT_DIM = 128
HID1 = 256
HID2 = 64
HID2P = 128           # fc2 output, lane padded
OUTPUT = 5
OUTP = 128            # lane-dense output block width
FL = 128              # feature lanes (21 padded to 128)
BP = 16               # padded graph-batch rows per chunk
LEAKY_SLOPE = 0.01    # nn.LeakyReLU default

# ---- constant-weight slab layout (bf16, zero padded, packed ONCE) ----
OFF_W1 = 0            # (128, 128)  real (21, 21)
OFF_W2 = 128          # (128, 128)  real (21, 21)
OFF_W3 = 256          # (128, 128)  real (21, 21)
OFF_WP = 384          # (128, 128)  real (21, 128)
OFF_WF1 = 512         # (128, 256)
OFF_WF2 = 640         # (256, 128)  real (256, 64)
OFF_WO = 896          # (128, 128)  real (64, 5)
OFF_B = 1024          # bias rows: b1, b2, b3, bp, bf1, bf2, bo
W_ROWS = 1040         # multiple of 16 (bf16 sublane tile)
W_COLS = 256


def _round_up(v, m):
    return (v + m - 1) // m * m


# ------------------------- Pallas kernel -------------------------

def _gcnn_kernel(a_ref, x_ref, p_ref, w_ref, o_ref):
    def mm(a, b):
        # Slab operands are already bf16 (casts are no-ops); only genuine f32
        # intermediates get converted.  f32 MXU accumulation.
        return jnp.dot(a.astype(jnp.bfloat16), b.astype(jnp.bfloat16),
                       preferred_element_type=jnp.float32)

    a = a_ref[0]          # (NP, NP)   bf16, zero padded
    x = x_ref[0]          # (NP, FL)   bf16, zero padded
    pool = p_ref[0]       # (BP, NP)   bf16, rows pre-normalized (mean pool)

    w1 = w_ref[OFF_W1:OFF_W1 + FL, 0:FL]
    w2 = w_ref[OFF_W2:OFF_W2 + FL, 0:FL]
    w3 = w_ref[OFF_W3:OFF_W3 + FL, 0:FL]
    wp = w_ref[OFF_WP:OFF_WP + FL, 0:OUTPUT_DIM]
    wf1 = w_ref[OFF_WF1:OFF_WF1 + OUTPUT_DIM, 0:HID1]
    wf2 = w_ref[OFF_WF2:OFF_WF2 + HID1, 0:HID2P]
    wo = w_ref[OFF_WO:OFF_WO + HID2P, 0:OUTP]
    b1 = w_ref[OFF_B + 0:OFF_B + 1, 0:FL]
    b2 = w_ref[OFF_B + 1:OFF_B + 2, 0:FL]
    b3 = w_ref[OFF_B + 2:OFF_B + 3, 0:FL]
    bp = w_ref[OFF_B + 3:OFF_B + 4, 0:OUTPUT_DIM]
    bf1 = w_ref[OFF_B + 4:OFF_B + 5, 0:HID1]
    bf2 = w_ref[OFF_B + 5:OFF_B + 6, 0:HID2P]
    bo = w_ref[OFF_B + 6:OFF_B + 7, 0:OUTP]

    # three chained GCN hops (exact, no A^3 fold): h <- A @ (h @ Wi) + bi
    h = mm(a, mm(x, w1)) + b1
    h = mm(a, mm(h, w2)) + b2
    h = mm(a, mm(h, w3)) + b3
    h = jnp.maximum(h, 0.0)                     # F.relu

    pooled = mm(pool, h)                        # global mean pool  (BP, FL)

    def leaky(v):
        return jnp.where(v > 0, v, LEAKY_SLOPE * v)

    z = leaky(mm(pooled, wp) + bp)              # (BP, 128)
    z = leaky(mm(z, wf1) + bf1)                 # (BP, 256)
    z = leaky(mm(z, wf2) + bf2)                 # (BP, 128)
    logits = mm(z, wo) + bo                     # (BP, 128), f32

    # softmax over the OUTPUT real classes; padded lanes masked out
    lane = jax.lax.broadcasted_iota(jnp.int32, logits.shape, 1)
    logits = jnp.where(lane < OUTPUT, logits, -1e30)
    m = jnp.max(logits, axis=-1, keepdims=True)
    e = jnp.exp(logits - m)
    inv = pl.reciprocal(jnp.sum(e, axis=-1, keepdims=True), approx=True)
    o_ref[0] = e * inv                          # full lane-dense block store


# ------------------------- Pallas forward -------------------------

@jax.jit
def gcnn_forward(a_hat, x, pool, weight_slab):
    """Batched GCNN forward.

    a_hat : (G, N, N)  normalized adjacencies, one per graph-chunk
    x     : (G, N, 21) node features
    pool  : (G, B, N)  mean-pool matrices (rows already divided by counts)
    weight_slab : (W_ROWS, W_COLS) bf16, built once by pack_weight_slab()
    """
    G, N, _ = a_hat.shape
    B = pool.shape[1]
    NP = _round_up(N, 128)            # node dim padded to lane multiple
    assert B <= BP

    # per-call work is only tiny zero-padding + bf16 cast of the graph data
    ap = jnp.pad(a_hat, ((0, 0), (0, NP - N), (0, NP - N))).astype(jnp.bfloat16)
    xp = jnp.pad(x, ((0, 0), (0, NP - N), (0, FL - NUM_FEATURES))).astype(jnp.bfloat16)
    pp = jnp.pad(pool, ((0, 0), (0, BP - B), (0, NP - N))).astype(jnp.bfloat16)

    flops = 2 * G * (3 * (NP * FL * FL + NP * NP * FL)
                     + BP * NP * FL
                     + BP * FL * OUTPUT_DIM
                     + BP * OUTPUT_DIM * HID1
                     + BP * HID1 * HID2P
                     + BP * HID2P * OUTP)
    bytes_accessed = (W_ROWS * W_COLS * 2
                      + G * (NP * NP + NP * FL + BP * NP) * 2
                      + G * BP * OUTP * 4)
    cost = pl.CostEstimate(flops=flops, transcendentals=G * BP * OUTP,
                           bytes_accessed=bytes_accessed)

    out_pad = pl.pallas_call(
        _gcnn_kernel,
        out_shape=jax.ShapeDtypeStruct((G, BP, OUTP), jnp.float32),
        grid=(G,),
        in_specs=[
            pl.BlockSpec((1, NP, NP), lambda g: (g, 0, 0)),   # per-chunk A
            pl.BlockSpec((1, NP, FL), lambda g: (g, 0, 0)),   # per-chunk X
            pl.BlockSpec((1, BP, NP), lambda g: (g, 0, 0)),   # per-chunk pool
            pl.BlockSpec((W_ROWS, W_COLS), lambda g: (0, 0)), # weights, resident
        ],
        out_specs=pl.BlockSpec((1, BP, OUTP), lambda g: (g, 0, 0)),
        compiler_params=pltpu.CompilerParams(
            dimension_semantics=("parallel",)),
        cost_estimate=cost,
    )(ap, xp, pp, weight_slab)

    # TODO(synk): for very large graph counts, accumulate `pooled` rows across
    # chunks and run the MLP head once with >=256 rows to fill the MXU.
    return out_pad[:, :B, :OUTPUT]


# ------------------------- weight packing (once) -------------------------

def pack_weight_slab(params):
    """Pack all constant parameters into one zero-padded bf16 slab (done once,
    outside the per-call hot path).  Zero padding of the unused rows/lanes is a
    correctness invariant (it keeps padded feature/class lanes exactly zero)."""
    (w1, b1, w2, b2, w3, b3, wp, bp, wf1, bf1, wf2, bf2, wo, bo) = params

    slab = jnp.zeros((W_ROWS, W_COLS), jnp.float32)

    def put(s, off, arr):
        r, c = arr.shape
        return s.at[off:off + r, :c].set(arr.astype(jnp.float32))

    slab = put(slab, OFF_W1, w1)        # (21, 21)
    slab = put(slab, OFF_W2, w2)        # (21, 21)
    slab = put(slab, OFF_W3, w3)        # (21, 21)
    slab = put(slab, OFF_WP, wp)        # (21, 128)
    slab = put(slab, OFF_WF1, wf1)      # (128, 256)
    slab = put(slab, OFF_WF2, wf2)      # (256, 64)
    slab = put(slab, OFF_WO, wo)        # (64, 5)
    slab = put(slab, OFF_B + 0, b1)     # (1, 21)
    slab = put(slab, OFF_B + 1, b2)     # (1, 21)
    slab = put(slab, OFF_B + 2, b3)     # (1, 21)
    slab = put(slab, OFF_B + 3, bp)     # (1, 128)
    slab = put(slab, OFF_B + 4, bf1)    # (1, 256)
    slab = put(slab, OFF_B + 5, bf2)    # (1, 64)
    slab = put(slab, OFF_B + 6, bo)     # (1, 5)
    return slab.astype(jnp.bfloat16)


# ------------------------- plain-JAX glue -------------------------

def build_gcn_norm_adj(edge_index, edge_weight, num_nodes):
    """Dense D^-1/2 (A + I) D^-1/2 matching torch_geometric gcn_norm
    (flow source_to_target, self-loop fill value 1.0)."""
    src, dst = edge_index[0], edge_index[1]
    A = jnp.zeros((num_nodes, num_nodes), jnp.float32)
    A = A.at[dst, src].add(edge_weight.astype(jnp.float32))   # A[dst, src] = w
    A = A + jnp.eye(num_nodes, dtype=jnp.float32)             # self loops (w=1)
    deg = jnp.sum(A, axis=1)
    dinv = jnp.where(deg > 0, 1.0 / jnp.sqrt(deg), 0.0)
    return A * dinv[:, None] * dinv[None, :]


def build_mean_pool_matrix(batch, num_graphs, num_nodes):
    onehot = (batch[None, :] == jnp.arange(num_graphs)[:, None]).astype(jnp.float32)
    counts = jnp.maximum(jnp.sum(onehot, axis=1, keepdims=True), 1.0)
    return onehot / counts  # (B, N)


def init_params(key):
    def dense(k, fan_in, fan_out):
        lim = 1.0 / jnp.sqrt(jnp.float32(fan_in))
        kw, kb = jax.random.split(k)
        w = jax.random.uniform(kw, (fan_in, fan_out), jnp.float32, -lim, lim)
        b = jax.random.uniform(kb, (1, fan_out), jnp.float32, -lim, lim)
        return w, b

    ks = jax.random.split(key, 7)
    w1, b1 = dense(ks[0], NUM_FEATURES, NUM_FEATURES)     # conv1
    w2, b2 = dense(ks[1], NUM_FEATURES, NUM_FEATURES)     # conv2
    w3, b3 = dense(ks[2], NUM_FEATURES, NUM_FEATURES)     # conv3
    wp, bp = dense(ks[3], NUM_FEATURES, OUTPUT_DIM)       # pro1_fc1
    wf1, bf1 = dense(ks[4], OUTPUT_DIM, HID1)             # fc1
    wf2, bf2 = dense(ks[5], HID1, HID2)                   # fc2
    wo, bo = dense(ks[6], HID2, OUTPUT)                   # out
    return (w1, b1, w2, b2, w3, b3, wp, bp, wf1, bf1, wf2, bf2, wo, bo)


def gcnn_reference(a_hat, x, pool, params):
    """Pure-JAX reference of the original (unfused) forward, f32."""
    (w1, b1, w2, b2, w3, b3, wp, bp, wf1, bf1, wf2, bf2, wo, bo) = params

    def gcn(h, w, b):
        return a_hat @ (h @ w) + b

    h = gcn(x, w1, b1)
    h = gcn(h, w2, b2)
    h = gcn(h, w3, b3)
    h = jnp.maximum(h, 0.0)
    p = pool @ h

    def leaky(v):
        return jnp.where(v > 0, v, LEAKY_SLOPE * v)

    z = leaky(p @ wp + bp)
    z = leaky(z @ wf1 + bf1)
    z = leaky(z @ wf2 + bf2)
    logits = z @ wo + bo
    return jax.nn.softmax(logits, axis=-1)


if __name__ == "__main__":
    key = jax.random.PRNGKey(0)
    k_params, k_data = jax.random.split(key)

    params = init_params(k_params)
    weight_slab = pack_weight_slab(params)     # packed ONCE, reused every call

    G, N, B, E = 2, 24, 2, 64   # 2 graph-chunks; each: 24 nodes, 2 graphs, 64 edges
    npg = N // B

    a_list, x_list, p_list = [], [], []
    for g, kd in enumerate(jax.random.split(k_data, G)):
        k_feat, k_src, k_off, k_dist = jax.random.split(kd, 4)

        prot_x = jax.random.normal(k_feat, (N, NUM_FEATURES), jnp.float32)

        graph_of_edge = jnp.repeat(jnp.arange(B), E // B)
        src_local = jax.random.randint(k_src, (E,), 0, npg)
        off = jax.random.randint(k_off, (E,), 1, npg)
        dst_local = (src_local + off) % npg
        prot_edge_index = jnp.stack([graph_of_edge * npg + src_local,
                                     graph_of_edge * npg + dst_local], axis=0)
        prot_dist = jax.random.uniform(k_dist, (E,), jnp.float32, 0.1, 2.0)
        prot_batch = jnp.repeat(jnp.arange(B), npg)

        a_list.append(build_gcn_norm_adj(prot_edge_index, prot_dist, N))
        x_list.append(prot_x)
        p_list.append(build_mean_pool_matrix(prot_batch, B, N))

    a_hat = jnp.stack(a_list)      # (G, N, N)
    xs = jnp.stack(x_list)         # (G, N, 21)
    pool = jnp.stack(p_list)       # (G, B, N)

    out = jax.block_until_ready(gcnn_forward(a_hat, xs, pool, weight_slab))
    ref = jnp.stack([gcnn_reference(a_hat[g], xs[g], pool[g], params)
                     for g in range(G)])

    assert out.shape == (G, B, OUTPUT)
    assert bool(jnp.all(jnp.isfinite(out)))
    assert bool(jnp.allclose(jnp.sum(out, axis=-1), 1.0, atol=2e-2))
    assert bool(jnp.allclose(out, ref, atol=5e-2))
    print("KERNEL_OK")
</pallas_src>

<mosaic_0001>
module attributes {stable_mosaic.version = 11 : i64} {
  func.func @_gcnn_kernel(%arg0: i32, %arg1: memref<1x128x128xbf16, #tpu.memory_space<vmem>>, %arg2: memref<1x128x128xbf16, #tpu.memory_space<vmem>>, %arg3: memref<1x16x128xbf16, #tpu.memory_space<vmem>>, %arg4: memref<1040x256xbf16, #tpu.memory_space<vmem>>, %arg5: memref<1x16x128xf32, #tpu.memory_space<vmem>>) attributes {dimension_semantics = [#tpu.dimension_semantics<parallel>], iteration_bounds = array<i64: 2>, scalar_prefetch = 0 : i64, scratch_operands = 0 : i64, tpu.core_type = #tpu.core_type<tc>, window_params = [{transform_indices = @transform_0, window_bounds = array<i64: 1, 128, 128>}, {transform_indices = @transform_1, window_bounds = array<i64: 1, 128, 128>}, {transform_indices = @transform_2, window_bounds = array<i64: 1, 16, 128>}, {pipeline_mode = #tpu.pipeline_mode<synchronous>, transform_indices = @transform_3, window_bounds = array<i64: 1040, 256>}, {transform_indices = @transform_4, window_bounds = array<i64: 1, 16, 128>}]} {
    %c0 = arith.constant 0 : index
    %c0_0 = arith.constant 0 : index
    %c0_1 = arith.constant 0 : index
    %0 = vector.load %arg1[%c0, %c0_0, %c0_1] : memref<1x128x128xbf16, #tpu.memory_space<vmem>>, vector<1x128x128xbf16>
    %1 = vector.shape_cast %0 : vector<1x128x128xbf16> to vector<128x128xbf16>
    %c0_2 = arith.constant 0 : index
    %c0_3 = arith.constant 0 : index
    %c0_4 = arith.constant 0 : index
    %2 = vector.load %arg2[%c0_2, %c0_3, %c0_4] : memref<1x128x128xbf16, #tpu.memory_space<vmem>>, vector<1x128x128xbf16>
    %3 = vector.shape_cast %2 : vector<1x128x128xbf16> to vector<128x128xbf16>
    %c0_5 = arith.constant 0 : index
    %c0_6 = arith.constant 0 : index
    %c0_7 = arith.constant 0 : index
    %4 = vector.load %arg3[%c0_5, %c0_6, %c0_7] : memref<1x16x128xbf16, #tpu.memory_space<vmem>>, vector<1x16x128xbf16>
    %5 = vector.shape_cast %4 : vector<1x16x128xbf16> to vector<16x128xbf16>
    %c0_8 = arith.constant 0 : index
    %c0_9 = arith.constant 0 : index
    %6 = vector.load %arg4[%c0_8, %c0_9] : memref<1040x256xbf16, #tpu.memory_space<vmem>>, vector<128x128xbf16>
    %c128 = arith.constant 128 : index
    %c0_10 = arith.constant 0 : index
    %7 = vector.load %arg4[%c128, %c0_10] : memref<1040x256xbf16, #tpu.memory_space<vmem>>, vector<128x128xbf16>
    %c256 = arith.constant 256 : index
    %c0_11 = arith.constant 0 : index
    %8 = vector.load %arg4[%c256, %c0_11] : memref<1040x256xbf16, #tpu.memory_space<vmem>>, vector<128x128xbf16>
    %c384 = arith.constant 384 : index
    %c0_12 = arith.constant 0 : index
    %9 = vector.load %arg4[%c384, %c0_12] : memref<1040x256xbf16, #tpu.memory_space<vmem>>, vector<128x128xbf16>
    %c512 = arith.constant 512 : index
    %c0_13 = arith.constant 0 : index
    %10 = vector.load %arg4[%c512, %c0_13] : memref<1040x256xbf16, #tpu.memory_space<vmem>>, vector<128x256xbf16>
    %c640 = arith.constant 640 : index
    %c0_14 = arith.constant 0 : index
    %11 = vector.load %arg4[%c640, %c0_14] : memref<1040x256xbf16, #tpu.memory_space<vmem>>, vector<256x128xbf16>
    %c896 = arith.constant 896 : index
    %c0_15 = arith.constant 0 : index
    %12 = vector.load %arg4[%c896, %c0_15] : memref<1040x256xbf16, #tpu.memory_space<vmem>>, vector<128x128xbf16>
    %c1024 = arith.constant 1024 : index
    %c0_16 = arith.constant 0 : index
    %13 = vector.load %arg4[%c1024, %c0_16] : memref<1040x256xbf16, #tpu.memory_space<vmem>>, vector<1x128xbf16>
    %c1025 = arith.constant 1025 : index
    %c0_17 = arith.constant 0 : index
    %14 = vector.load %arg4[%c1025, %c0_17] : memref<1040x256xbf16, #tpu.memory_space<vmem>>, vector<1x128xbf16>
    %c1026 = arith.constant 1026 : index
    %c0_18 = arith.constant 0 : index
    %15 = vector.load %arg4[%c1026, %c0_18] : memref<1040x256xbf16, #tpu.memory_space<vmem>>, vector<1x128xbf16>
    %c1027 = arith.constant 1027 : index
    %c0_19 = arith.constant 0 : index
    %16 = vector.load %arg4[%c1027, %c0_19] : memref<1040x256xbf16, #tpu.memory_space<vmem>>, vector<1x128xbf16>
    %c1028 = arith.constant 1028 : index
    %c0_20 = arith.constant 0 : index
    %17 = vector.load %arg4[%c1028, %c0_20] : memref<1040x256xbf16, #tpu.memory_space<vmem>>, vector<1x256xbf16>
    %c1029 = arith.constant 1029 : index
    %c0_21 = arith.constant 0 : index
    %18 = vector.load %arg4[%c1029, %c0_21] : memref<1040x256xbf16, #tpu.memory_space<vmem>>, vector<1x128xbf16>
    %c1030 = arith.constant 1030 : index
    %c0_22 = arith.constant 0 : index
    %19 = vector.load %arg4[%c1030, %c0_22] : memref<1040x256xbf16, #tpu.memory_space<vmem>>, vector<1x128xbf16>
    %cst = arith.constant dense<0.000000e+00> : vector<128x128xf32>
    %20 = tpu.matmul %3, %6, %cst {dimension_numbers = #tpu.dot_dimension_numbers<[1], [0], [0], [1], [0, 0, 1, 1], [], []>} : vector<128x128xbf16>, vector<128x128xbf16>, vector<128x128xf32> -> vector<128x128xf32>
    %21 = arith.truncf %20 : vector<128x128xf32> to vector<128x128xbf16>
    %cst_23 = arith.constant dense<0.000000e+00> : vector<128x128xf32>
    %22 = tpu.matmul %1, %21, %cst_23 {dimension_numbers = #tpu.dot_dimension_numbers<[1], [0], [0], [1], [0, 0, 1, 1], [], []>} : vector<128x128xbf16>, vector<128x128xbf16>, vector<128x128xf32> -> vector<128x128xf32>
    %23 = arith.extf %13 : vector<1x128xbf16> to vector<1x128xf32>
    %24 = vector.broadcast %23 : vector<1x128xf32> to vector<128x128xf32>
    %25 = arith.addf %22, %24 : vector<128x128xf32>
    %26 = arith.truncf %25 : vector<128x128xf32> to vector<128x128xbf16>
    %cst_24 = arith.constant dense<0.000000e+00> : vector<128x128xf32>
    %27 = tpu.matmul %26, %7, %cst_24 {dimension_numbers = #tpu.dot_dimension_numbers<[1], [0], [0], [1], [0, 0, 1, 1], [], []>} : vector<128x128xbf16>, vector<128x128xbf16>, vector<128x128xf32> -> vector<128x128xf32>
    %28 = arith.truncf %27 : vector<128x128xf32> to vector<128x128xbf16>
    %cst_25 = arith.constant dense<0.000000e+00> : vector<128x128xf32>
    %29 = tpu.matmul %1, %28, %cst_25 {dimension_numbers = #tpu.dot_dimension_numbers<[1], [0], [0], [1], [0, 0, 1, 1], [], []>} : vector<128x128xbf16>, vector<128x128xbf16>, vector<128x128xf32> -> vector<128x128xf32>
    %30 = arith.extf %14 : vector<1x128xbf16> to vector<1x128xf32>
    %31 = vector.broadcast %30 : vector<1x128xf32> to vector<128x128xf32>
    %32 = arith.addf %29, %31 : vector<128x128xf32>
    %33 = arith.truncf %32 : vector<128x128xf32> to vector<128x128xbf16>
    %cst_26 = arith.constant dense<0.000000e+00> : vector<128x128xf32>
    %34 = tpu.matmul %33, %8, %cst_26 {dimension_numbers = #tpu.dot_dimension_numbers<[1], [0], [0], [1], [0, 0, 1, 1], [], []>} : vector<128x128xbf16>, vector<128x128xbf16>, vector<128x128xf32> -> vector<128x128xf32>
    %35 = arith.truncf %34 : vector<128x128xf32> to vector<128x128xbf16>
    %cst_27 = arith.constant dense<0.000000e+00> : vector<128x128xf32>
    %36 = tpu.matmul %1, %35, %cst_27 {dimension_numbers = #tpu.dot_dimension_numbers<[1], [0], [0], [1], [0, 0, 1, 1], [], []>} : vector<128x128xbf16>, vector<128x128xbf16>, vector<128x128xf32> -> vector<128x128xf32>
    %37 = arith.extf %15 : vector<1x128xbf16> to vector<1x128xf32>
    %38 = vector.broadcast %37 : vector<1x128xf32> to vector<128x128xf32>
    %39 = arith.addf %36, %38 : vector<128x128xf32>
    %cst_28 = arith.constant 0.000000e+00 : f32
    %40 = vector.broadcast %cst_28 : f32 to vector<128x128xf32>
    %41 = arith.maximumf %39, %40 : vector<128x128xf32>
    %42 = arith.truncf %41 : vector<128x128xf32> to vector<128x128xbf16>
    %cst_29 = arith.constant dense<0.000000e+00> : vector<16x128xf32>
    %43 = tpu.matmul %5, %42, %cst_29 {dimension_numbers = #tpu.dot_dimension_numbers<[1], [0], [0], [1], [0, 0, 1, 1], [], []>} : vector<16x128xbf16>, vector<128x128xbf16>, vector<16x128xf32> -> vector<16x128xf32>
    %44 = arith.truncf %43 : vector<16x128xf32> to vector<16x128xbf16>
    %cst_30 = arith.constant dense<0.000000e+00> : vector<16x128xf32>
    %45 = tpu.matmul %44, %9, %cst_30 {dimension_numbers = #tpu.dot_dimension_numbers<[1], [0], [0], [1], [0, 0, 1, 1], [], []>} : vector<16x128xbf16>, vector<128x128xbf16>, vector<16x128xf32> -> vector<16x128xf32>
    %46 = arith.extf %16 : vector<1x128xbf16> to vector<1x128xf32>
    %47 = vector.broadcast %46 : vector<1x128xf32> to vector<16x128xf32>
    %48 = arith.addf %45, %47 : vector<16x128xf32>
    %cst_31 = arith.constant 0.000000e+00 : f32
    %49 = vector.broadcast %cst_31 : f32 to vector<16x128xf32>
    %50 = arith.cmpf ogt, %48, %49 : vector<16x128xf32>
    %cst_32 = arith.constant 0.00999999977 : f32
    %51 = vector.broadcast %cst_32 : f32 to vector<16x128xf32>
    %52 = arith.mulf %51, %48 : vector<16x128xf32>
    %53 = arith.select %50, %48, %52 : vector<16x128xi1>, vector<16x128xf32>
    %54 = arith.truncf %53 : vector<16x128xf32> to vector<16x128xbf16>
    %cst_33 = arith.constant dense<0.000000e+00> : vector<16x256xf32>
    %55 = tpu.matmul %54, %10, %cst_33 {dimension_numbers = #tpu.dot_dimension_numbers<[1], [0], [0], [1], [0, 0, 1, 1], [], []>} : vector<16x128xbf16>, vector<128x256xbf16>, vector<16x256xf32> -> vector<16x256xf32>
    %56 = arith.extf %17 : vector<1x256xbf16> to vector<1x256xf32>
    %57 = vector.broadcast %56 : vector<1x256xf32> to vector<16x256xf32>
    %58 = arith.addf %55, %57 : vector<16x256xf32>
    %cst_34 = arith.constant 0.000000e+00 : f32
    %59 = vector.broadcast %cst_34 : f32 to vector<16x256xf32>
    %60 = arith.cmpf ogt, %58, %59 : vector<16x256xf32>
    %cst_35 = arith.constant 0.00999999977 : f32
    %61 = vector.broadcast %cst_35 : f32 to vector<16x256xf32>
    %62 = arith.mulf %61, %58 : vector<16x256xf32>
    %63 = arith.select %60, %58, %62 : vector<16x256xi1>, vector<16x256xf32>
    %64 = arith.truncf %63 : vector<16x256xf32> to vector<16x256xbf16>
    %cst_36 = arith.constant dense<0.000000e+00> : vector<16x128xf32>
    %65 = tpu.matmul %64, %11, %cst_36 {dimension_numbers = #tpu.dot_dimension_numbers<[1], [0], [0], [1], [0, 0, 1, 1], [], []>} : vector<16x256xbf16>, vector<256x128xbf16>, vector<16x128xf32> -> vector<16x128xf32>
    %66 = arith.extf %18 : vector<1x128xbf16> to vector<1x128xf32>
    %67 = vector.broadcast %66 : vector<1x128xf32> to vector<16x128xf32>
    %68 = arith.addf %65, %67 : vector<16x128xf32>
    %cst_37 = arith.constant 0.000000e+00 : f32
    %69 = vector.broadcast %cst_37 : f32 to vector<16x128xf32>
    %70 = arith.cmpf ogt, %68, %69 : vector<16x128xf32>
    %cst_38 = arith.constant 0.00999999977 : f32
    %71 = vector.broadcast %cst_38 : f32 to vector<16x128xf32>
    %72 = arith.mulf %71, %68 : vector<16x128xf32>
    %73 = arith.select %70, %68, %72 : vector<16x128xi1>, vector<16x128xf32>
    %74 = arith.truncf %73 : vector<16x128xf32> to vector<16x128xbf16>
    %cst_39 = arith.constant dense<0.000000e+00> : vector<16x128xf32>
    %75 = tpu.matmul %74, %12, %cst_39 {dimension_numbers = #tpu.dot_dimension_numbers<[1], [0], [0], [1], [0, 0, 1, 1], [], []>} : vector<16x128xbf16>, vector<128x128xbf16>, vector<16x128xf32> -> vector<16x128xf32>
    %76 = arith.extf %19 : vector<1x128xbf16> to vector<1x128xf32>
    %77 = vector.broadcast %76 : vector<1x128xf32> to vector<16x128xf32>
    %78 = arith.addf %75, %77 : vector<16x128xf32>
    %79 = tpu.iota {dimensions = array<i32: 1>} : vector<16x128xi32>
    %c5_i32 = arith.constant 5 : i32
    %80 = vector.broadcast %c5_i32 : i32 to vector<16x128xi32>
    %81 = arith.cmpi slt, %79, %80 : vector<16x128xi32>
    %cst_40 = arith.constant -1.000000e+30 : f32
    %82 = vector.broadcast %cst_40 : f32 to vector<16x128xf32>
    %83 = arith.select %81, %78, %82 : vector<16x128xi1>, vector<16x128xf32>
    %cst_41 = arith.constant dense<0xFF800000> : vector<16xf32>
    %84 = vector.multi_reduction <maximumf>, %83, %cst_41 [1] : vector<16x128xf32> to vector<16xf32>
    %85 = vector.shape_cast %84 : vector<16xf32> to vector<16x1xf32>
    %86 = vector.broadcast %85 : vector<16x1xf32> to vector<16x128xf32>
    %87 = arith.subf %83, %86 : vector<16x128xf32>
    %88 = math.exp %87 : vector<16x128xf32>
    %cst_42 = arith.constant dense<0.000000e+00> : vector<16xf32>
    %89 = vector.multi_reduction <add>, %88, %cst_42 [1] : vector<16x128xf32> to vector<16xf32>
    %90 = vector.shape_cast %89 : vector<16xf32> to vector<16x1xf32>
    %91 = tpu.reciprocal %90 {approx = true} : vector<16x1xf32> -> vector<16x1xf32>
    %92 = vector.broadcast %91 : vector<16x1xf32> to vector<16x128xf32>
    %93 = arith.mulf %88, %92 : vector<16x128xf32>
    %c0_43 = arith.constant 0 : index
    %c0_44 = arith.constant 0 : index
    %c0_45 = arith.constant 0 : index
    %94 = vector.load %arg5[%c0_43, %c0_44, %c0_45] : memref<1x16x128xf32, #tpu.memory_space<vmem>>, vector<1x16x128xf32>
    %95 = vector.shape_cast %94 : vector<1x16x128xf32> to vector<16x128xf32>
    %96 = vector.shape_cast %93 : vector<16x128xf32> to vector<1x16x128xf32>
    tpu.vector_store %arg5[%c0_43, %c0_44, %c0_45], %96 {strides = array<i32>} : memref<1x16x128xf32, #tpu.memory_space<vmem>>, vector<1x16x128xf32>,
    return
  }
  func.func @transform_0(%arg0: i32) -> (i32, i32, i32) {
    %c0_i32 = arith.constant 0 : i32
    %c0_i32_0 = arith.constant 0 : i32
    %c0_i32_1 = arith.constant 0 : i32
    return %arg0, %c0_i32, %c0_i32_0 : i32, i32, i32
  }
  func.func @transform_1(%arg0: i32) -> (i32, i32, i32) {
    %c0_i32 = arith.constant 0 : i32
    %c0_i32_0 = arith.constant 0 : i32
    %c0_i32_1 = arith.constant 0 : i32
    return %arg0, %c0_i32, %c0_i32_0 : i32, i32, i32
  }
  func.func @transform_2(%arg0: i32) -> (i32, i32, i32) {
    %c0_i32 = arith.constant 0 : i32
    %c0_i32_0 = arith.constant 0 : i32
    %c0_i32_1 = arith.constant 0 : i32
    return %arg0, %c0_i32, %c0_i32_0 : i32, i32, i32
  }
  func.func @transform_3(%arg0: i32) -> (i32, i32) {
    %c0_i32 = arith.constant 0 : i32
    %c0_i32_0 = arith.constant 0 : i32
    %c0_i32_1 = arith.constant 0 : i32
    return %c0_i32, %c0_i32_0 : i32, i32
  }
  func.func @transform_4(%arg0: i32) -> (i32, i32, i32) {
    %c0_i32 = arith.constant 0 : i32
    %c0_i32_0 = arith.constant 0 : i32
    %c0_i32_1 = arith.constant 0 : i32
    return %arg0, %c0_i32, %c0_i32_0 : i32, i32, i32
  }
}

</mosaic_0001>

<bundles_post_ra>
// kernel: gcnn_forward.1
= control target key start
LH: loop header
LB: loop body
LE: loop exit
PB: predicated region body
PF: predicated region fallthrough
CT: control target
= control target key end

     0   :  { %9 = vsyncpa [#allocation3], 0  ;;  %s2682_s15 = smov 0   ;;  %s2867_s0 = inlined_call_operand.vmem [shape: bf16[2,128,128], index: 0, kind: input, shape index: {}]   ;;  %s2868_s1 = inlined_call_operand.vmem [shape: bf16[2,128,128], index: 1, kind: input, shape index: {}]   ;;  %s2869_s2 = inlined_call_operand.vmem [shape: bf16[2,16,128], index: 2, kind: input, shape index: {}]   ;;  %s2870_s3 = inlined_call_operand.hbm [shape: bf16[1040,256], index: 3, kind: input, shape index: {}]   ;;  %s2871_s4 = inlined_call_operand.vmem [shape: f32[2,16,128], index: 4, kind: output, shape index: {}]  }
   0x1 LB: > { %s2688_s16 = sadd.s32 4294967295, %s2649_s15   ;;  %p1977_p0 = scmp.ge.s32.totalorder %s2649_s15, 1  ;;  %s2649_s15 = sphi %s2682_s15, %s15_s15  }
   0x2   : > { %p145_p1 = scmp.lt.s32.totalorder %s2649_s15, 3  ;;  %s2651_s17 = smov [#allocation2]  }
   0x3   : > { %s157_s18 = sshll.u32 %s2651_s17, 4  ;;  %p2872_p3 = scmp.eq.s32.totalorder %s2688_s16, 0  ;;  %s158_s18 = int_to_ptr.vmem [resolvable:$true] %s157_s18 }
   0x4   : > { %p2692_p2 = pnand %p1977_p0, %p145_p1  ;;  %s2611_s23 = scalar_lea.hbm %s2870_s3, 16640 }
   0x5   : > { %p2612_p6 = scmp.ne.s32.totalorder %s2870_s3, %s2611_s23  ;;  %p2618_p10 = scmp.lt.u32.totalorder %s2611_s23, %s2870_s3 }
   0x6   : > { %s2874_s19 = scalar_select %p2692_p2, 1, 0 }
   0x7   : > { %p2486_p4 = pneg %p2692_p2 }
   0x9   : > { %p2701_p5 = pnand %p2872_p3, %p2486_p4 }
   0xb   : > { %p2613_p7 = pneg %p2701_p5 }
   0xd   : > { %p2614_p8 = pnand %p2613_p7, %p2612_p6 }
   0xf   : > { %p2615_p9 = pneg %p2614_p8 }
  0x11   : > { %p2620_p11 = pnand %p2618_p10, %p2615_p9 }
  0x13   : > { %2623 = shalt.err (!%p2620_p11)
}
  0x14   : > { %s2624_s28 = scalar_lea.vmem %s158_s18, 16640  ;;  %p2632_p1 = scmp.lt.s32.totalorder %s158_s18, %s158_s18 }
  0x15   : > { %p2625_p12 = scmp.ne.s32.totalorder %s158_s18, %s2624_s28  ;;  %p2633_p4 = scmp.lt.s32.totalorder %s2624_s28, %s2624_s28 }
  0x17   : > { %p2627_p13 = pnand %p2625_p12, %p2613_p7  ;;  %p2634_p3 = por %p2633_p4, %p2632_p1 }
  0x19   : > { %p2628_p0 = pneg %p2627_p13 }
  0x1b   : > { %p2635_p2 = pnand %p2634_p3, %p2628_p0 }
  0x1d   : > { %2638 = shalt.err (!%p2635_p2)
}
  0x1e   : > { %s2652_s29 = smov 128   ;;  %s2653_s30 = smov 8  }
  0x1f   : > { %2489 = dma.hbm_to_vmem [thread:$0]  (!%p2701_p5), %s2870_s3, 16640, %s158_s18, [#allocation3], %s2652_s29, %s2652_s29, %s2653_s30  }
  0x20   : > { %p2876_p6 = scmp.ne.s32.totalorder %s2874_s19, 0 }
  0x21   : > { %p2877_p8 = scmp.eq.s32.totalorder (!%p2876_p6), %s2688_s16, 0 }
  0x22   : > { %197 = sbr.rel (%p2876_p6) target bundleno = 2930 (0xb72), region = 36 }
  0x29   : > { %2644 = dma.done.wait (%p2877_p8), [#allocation3], 16640   ;;  %p2878_p7 = pmov %p2877_p8 }
  0x2a   : > { %p233_p2 = scmp.lt.s32.totalorder %s2688_s16, 1  ;;  %v2506_v0 = vld [vmem:[#allocation2] ss:$8 sps:$4 sm:$0xff]   ;;  %v2507_v1 = vld [vmem:[#allocation2 + $0x10] ss:$8 sps:$4 sm:$0xff]   ;;  %v623_v56 = vlaneseq  ;;  %vm2655_vm0 = vmmov 0  }
  0x2b   : > { %2646 = vsyncadd (%p2878_p7), [#allocation3], 4294950656  ;;  %2230 = vmatprep.subr.bf16.mxu0 %v2506_v0  ;;  %v2508_v2 = vld [vmem:[#allocation2 + $0x20] ss:$8 sps:$4 sm:$0xff]   ;;  %v2509_v3 = vld [vmem:[#allocation2 + $0x30] ss:$8 sps:$4 sm:$0xff]  }
  0x2c   : > { %s2880_s16 = smov (!%p233_p2, %s2688_s16), 1  ;;  %2231 = vmatpush3.bf16.msra.mxu0 %v2506_v0  ;;  %v2510_v5 = vld [vmem:[#allocation2 + $0x40] ss:$8 sps:$4 sm:$0xff]   ;;  %v2511_v6 = vld [vmem:[#allocation2 + $0x50] ss:$8 sps:$4 sm:$0xff]   ;;  %v2784_v57 = vshrl.u32 %v623_v56, 7 }
  0x2d   : > { %s2081_s7 = sshll.u32 %s2880_s16, 6  ;;  %2232 = vmatprep.subr.bf16.mxu0 %v2507_v1  ;;  %v2512_v7 = vld [vmem:[#allocation2 + $0x60] ss:$8 sps:$4 sm:$0xff]   ;;  %v2513_v8 = vld [vmem:[#allocation2 + $0x70] ss:$8 sps:$4 sm:$0xff]   ;;  %s2083_s14 = sshll.u32 %s2880_s16, 3 }
  0x2e   : > { %s2735_s10 = scalar_lea.vmem %s2868_s1, %s2081_s7  ;;  %s2741_s13 = scalar_lea.vmem %s2867_s0, %s2081_s7  ;;  %v2530_v17 = vld [vmem:[#allocation2 + $0x80] ss:$8 sps:$4 sm:$0xff]   ;;  %v2531_v18 = vld [vmem:[#allocation2 + $0x90] ss:$8 sps:$4 sm:$0xff]   ;;  %v625_v60 = vsub.s32 0, %v2784_v57 }
  0x2f   : > { %v2514_v4 = vld [vmem:[%s2735_s10] sm:$0xff]   ;;  %v2515_v9 = vld [vmem:[%s2735_s10 + $0x8] sm:$0xff]   ;;  %v2516_v10 = vld [vmem:[%s2735_s10 + $0x10] sm:$0xff]   ;;  %s2816_s19 = scalar_lea.vmem %s2869_s2, %s2083_s14  ;;  %s2084_s20 = sshll.u32 %s2880_s16, 4 }
  0x30   : > { %2233 = vmatpush3.bf16.msra.mxu0 %v2507_v1  ;;  %2246 = vmatprep.mubr.bf16.mxu0 %v2514_v4  ;;  %v2517_v11 = vld [vmem:[%s2735_s10 + $0x18] sm:$0xff]   ;;  %v2518_v12 = vld [vmem:[%s2735_s10 + $0x20] sm:$0xff]   ;;  %v2519_v13 = vld [vmem:[%s2735_s10 + $0x28] sm:$0xff]   ;;  %s252_s23 = scalar_lea.vmem %s2871_s4, %s2084_s20 }
  0x31   : > { %2234 = vmatprep.subr.bf16.mxu0 %v2508_v2  ;;  %v2520_v14 = vld [vmem:[%s2735_s10 + $0x30] sm:$0xff]   ;;  %v2521_v15 = vld [vmem:[%s2735_s10 + $0x38] sm:$0xff]   ;;  %v2751_v16 = vld [vmem:[%s2741_s13] sm:$0xff]  }
  0x32   : > { %2278 = vmatprep.mubr.bf16.mxu1 %v2751_v16  ;;  %v2532_v19 = vld [vmem:[#allocation2 + $0xa0] ss:$8 sps:$4 sm:$0xff]   ;;  %v2533_v20 = vld [vmem:[#allocation2 + $0xb0] ss:$8 sps:$4 sm:$0xff]  }
  0x33   : > { %v2534_v21 = vld [vmem:[#allocation2 + $0xc0] ss:$8 sps:$4 sm:$0xff]   ;;  %v2535_v22 = vld [vmem:[#allocation2 + $0xd0] ss:$8 sps:$4 sm:$0xff]  }
  0x34   : > { %2235 = vmatpush3.bf16.msra.mxu0 %v2508_v2  ;;  %v2755_v47 = vld [vmem:[%s2741_s13 + $0x8] sm:$0xff]   ;;  %v2758_v48 = vld [vmem:[%s2741_s13 + $0x10] sm:$0xff]   ;;  %v2763_v49 = vld [vmem:[%s2741_s13 + $0x18] sm:$0xff]  }
  0x35   : > { %2236 = vmatprep.subr.bf16.mxu0 %v2509_v3  ;;  %v2766_v50 = vld [vmem:[%s2741_s13 + $0x20] sm:$0xff]   ;;  %v2771_v51 = vld [vmem:[%s2741_s13 + $0x28] sm:$0xff]   ;;  %v2774_v52 = vld [vmem:[%s2741_s13 + $0x30] sm:$0xff]  }
  0x36   : > { %v2779_v53 = vld [vmem:[%s2741_s13 + $0x38] sm:$0xff]   ;;  %v2536_v54 = vld [vmem:[#allocation2 + $0xe0] ss:$8 sps:$4 sm:$0xff]  }
  0x37   : > { %v2537_v55 = vld [vmem:[#allocation2 + $0xf0] ss:$8 sps:$4 sm:$0xff]   ;;  %v2786_v58 = vld [vmem:[#allocation2 + $0x400] sm:$0x1] }
  0x38   : > { %2237 = vmatpush3.bf16.msra.mxu0 %v2509_v3  ;;  %v622_v59 = vunpack.c.l.bf16 %v2786_v58 }
  0x39   : > { %2238 = vmatprep.subr.bf16.mxu0 %v2510_v5 }
  0x3a   : > { %v626_v61 = vrot.slane %v622_v59, %v625_v60 }
  0x3c   : > { %2239 = vmatpush3.bf16.msra.mxu0 %v2510_v5 }
  0x3d   : > { %2240 = vmatprep.subr.bf16.mxu0 %v2511_v6 }
  0x40   : > { %2241 = vmatpush3.bf16.msra.mxu0 %v2511_v6 }
  0x41   : > { %2242 = vmatprep.subr.bf16.mxu0 %v2512_v7 }
  0x44   : > { %2243 = vmatpush3.bf16.msra.mxu0 %v2512_v7 }
  0x45   : > { %2244 = vmatprep.subr.bf16.mxu0 %v2513_v8 }
  0x48   : > { %2245 = vmatpush3.bf16.msra.mxu0 %v2513_v8 }
  0x49   : > { %2294 = vmatprep.subr.bf16.mxu0 %v2530_v17 }
  0x4b   : > { %2247 = vmatmul.mubr.bf16.vlgmr.msra.gmra.mrb[0].mxu0 %v2515_v9 }
  0x4c   : > { %2250 = vmatprep.mubr.bf16.mxu0 %v2516_v10  ;;  %2295 = vmatpush3.bf16.msra.mxu0 %v2530_v17 }
  0x4d   : > { %2296 = vmatprep.subr.bf16.mxu0 %v2531_v18 }
  0x50   : > { %2297 = vmatpush3.bf16.msra.mxu0 %v2531_v18 }
  0x51   : > { %2298 = vmatprep.subr.bf16.mxu0 %v2532_v19 }
  0x53   : > { %2251 = vmatmul.mubr.bf16.gmra.mrb[4].mxu0 %v2517_v11 }
  0x54   : > { %2254 = vmatprep.mubr.bf16.mxu0 %v2518_v12  ;;  %2299 = vmatpush3.bf16.msra.mxu0 %v2532_v19 }
  0x55   : > { %2300 = vmatprep.subr.bf16.mxu0 %v2533_v20 }
  0x58   : > { %2301 = vmatpush3.bf16.msra.mxu0 %v2533_v20 }
  0x59   : > { %2302 = vmatprep.subr.bf16.mxu0 %v2534_v21 }
  0x5b   : > { %2255 = vmatmul.mubr.bf16.gmra.mrb[8].mxu0 %v2519_v13 }
  0x5c   : > { %2258 = vmatprep.mubr.bf16.mxu0 %v2520_v14  ;;  %2303 = vmatpush3.bf16.msra.mxu0 %v2534_v21 }
  0x5d   : > { %2304 = vmatprep.subr.bf16.mxu0 %v2535_v22 }
  0x60   : > { %2305 = vmatpush3.bf16.msra.mxu0 %v2535_v22 }
  0x61   : > { %2306 = vmatprep.subr.bf16.mxu0 %v2536_v54 }
  0x63   : > { %2259 = vmatmul.mubr.bf16.gmra.mrb[12].mxu0 %v2521_v15 }
  0x64   : > { %2307 = vmatpush3.bf16.msra.mxu0 %v2536_v54 }
  0x65   : > { %2308 = vmatprep.subr.bf16.mxu0 %v2537_v55 }
  0x68   : > { %2309 = vmatpush3.bf16.msra.mxu0 %v2537_v55 }
 0x11e   : > { %v2248_v23 = vpop.f32.mrb[0].mxu0 }
 0x11f   : > { %v551_v24 = vpop.f32.mrb[1].mxu0 }
 0x120   : > { %v2249_v25 = vpop.f32.mrb[2].mxu0 }
 0x121   : > { %v615_v26 = vpack.c.bf16 %v2249_v25, %v2248_v23  ;;  %v554_v27 = vpop.f32.mrb[3].mxu0 }
 0x122   : > { %v614_v28 = vpack.c.bf16 %v554_v27, %v551_v24 }
 0x124   : > { %2262 = vmatprep.subr.bf16.mxu1 %v614_v28 }
 0x125   : > { %2263 = vmatpush3.bf16.msra.mxu1 %v614_v28 }
 0x126   : > { %v2252_v29 = vpop.f32.mrb[4].mxu0  ;;  %2264 = vmatprep.subr.bf16.mxu1 %v615_v26 }
 0x127   : > { %v567_v30 = vpop.f32.mrb[5].mxu0 }
 0x128   : > { %v2253_v31 = vpop.f32.mrb[6].mxu0 }
 0x129   : > { %v617_v32 = vpack.c.bf16 %v2253_v31, %v2252_v29  ;;  %v570_v33 = vpop.f32.mrb[7].mxu0  ;;  %2265 = vmatpush3.bf16.msra.mxu1 %v615_v26 }
 0x12a   : > { %v616_v34 = vpack.c.bf16 %v570_v33, %v567_v30 }
 0x12c   : > { %2266 = vmatprep.subr.bf16.mxu1 %v616_v34 }
 0x12d   : > { %2267 = vmatpush3.bf16.msra.mxu1 %v616_v34 }
 0x12e   : > { %v2256_v35 = vpop.f32.mrb[8].mxu0  ;;  %2268 = vmatprep.subr.bf16.mxu1 %v617_v32 }
 0x12f   : > { %v583_v36 = vpop.f32.mrb[9].mxu0 }
 0x130   : > { %v2257_v37 = vpop.f32.mrb[10].mxu0 }
 0x131   : > { %v619_v38 = vpack.c.bf16 %v2257_v37, %v2256_v35  ;;  %v586_v39 = vpop.f32.mrb[11].mxu0  ;;  %2269 = vmatpush3.bf16.msra.mxu1 %v617_v32 }
 0x132   : > { %v618_v40 = vpack.c.bf16 %v586_v39, %v583_v36  ;;  %v2538_v39 = vld [vmem:[#allocation2 + $0x100] ss:$8 sps:$4 sm:$0xff]  }
 0x133   : > { %2358 = vmatprep.subr.bf16.mxu0 %v2538_v39 }
 0x134   : > { %2270 = vmatprep.subr.bf16.mxu1 %v618_v40 }
 0x135   : > { %2271 = vmatpush3.bf16.msra.mxu1 %v618_v40  ;;  %v2539_v40 = vld [vmem:[#allocation2 + $0x110] ss:$8 sps:$4 sm:$0xff]  }
 0x136   : > { %v2260_v41 = vpop.f32.mrb[12].mxu0  ;;  %2272 = vmatprep.subr.bf16.mxu1 %v619_v38 }
 0x137   : > { %v599_v42 = vpop.f32.mrb[13].mxu0 }
 0x138   : > { %v2261_v43 = vpop.f32.mrb[14].mxu0 }
 0x139   : > { %v621_v44 = vpack.c.bf16 %v2261_v43, %v2260_v41  ;;  %v602_v45 = vpop.f32.mrb[15].mxu0  ;;  %2273 = vmatpush3.bf16.msra.mxu1 %v619_v38  ;;  %v2540_v41 = vld [vmem:[#allocation2 + $0x120] ss:$8 sps:$4 sm:$0xff]  }
 0x13a   : > { %v620_v46 = vpack.c.bf16 %v602_v45, %v599_v42  ;;  %v2541_v42 = vld [vmem:[#allocation2 + $0x130] ss:$8 sps:$4 sm:$0xff]   ;;  %v2542_v43 = vld [vmem:[#allocation2 + $0x140] ss:$8 sps:$4 sm:$0xff]  }
 0x13c   : > { %2274 = vmatprep.subr.bf16.mxu1 %v620_v46 }
 0x13d   : > { %2275 = vmatpush3.bf16.msra.mxu1 %v620_v46 }
 0x13e   : > { %2276 = vmatprep.subr.bf16.mxu1 %v621_v44 }
 0x141   : > { %2277 = vmatpush3.bf16.msra.mxu1 %v621_v44  ;;  %v2543_v44 = vld [vmem:[#allocation2 + $0x150] ss:$8 sps:$4 sm:$0xff]  }
 0x144   : > { %2279 = vmatmul.mubr.bf16.vlgmr.msra.gmra.mrb[0].mxu1 %v2755_v47 }
 0x145   : > { %2282 = vmatprep.mubr.bf16.mxu1 %v2758_v48 }
 0x14c   : > { %2283 = vmatmul.mubr.bf16.gmra.mrb[4].mxu1 %v2763_v49 }
 0x14d   : > { %2286 = vmatprep.mubr.bf16.mxu1 %v2766_v50 }
 0x154   : > { %2287 = vmatmul.mubr.bf16.gmra.mrb[8].mxu1 %v2771_v51 }
 0x155   : > { %2290 = vmatprep.mubr.bf16.mxu1 %v2774_v52 }
 0x15c   : > { %2291 = vmatmul.mubr.bf16.gmra.mrb[12].mxu1 %v2779_v53 }
 0x15d   : > { %2342 = vmatprep.mubr.bf16.mxu1 %v2751_v16 }
 0x217   : > { %v2280_v62 = vpop.f32.mrb[0].mxu1 }
 0x218   : > { %v709_v63 = vpop.f32.mrb[1].mxu1  ;;  %v718_v1 = vadd.f32 %v2280_v62, %v626_v61 }
 0x219   : > { %v2281_v0 = vpop.f32.mrb[2].mxu1  ;;  %v710_v4 = vadd.f32 %v709_v63, %v626_v61 }
 0x21a   : > { %v721_v2 = vadd.f32 %v2281_v0, %v626_v61  ;;  %v712_v3 = vpop.f32.mrb[3].mxu1 }
 0x21b   : > { %v713_v5 = vadd.f32 %v712_v3, %v626_v61 }
 0x21c   : > { %v773_v6 = vpack.c.bf16 %v721_v2, %v718_v1 }
 0x21d   : > { %v772_v7 = vpack.c.bf16 %v713_v5, %v710_v4 }
 0x21f   : > { %v2284_v8 = vpop.f32.mrb[4].mxu1  ;;  %2310 = vmatprep.mubr.bf16.mxu0 %v772_v7 }
 0x220   : > { %v725_v9 = vpop.f32.mrb[5].mxu1  ;;  %2311 = vmatmul.mubr.bf16.vlgmr.msra.gmra.mrb[16].mxu0 %v773_v6  ;;  %v734_v11 = vadd.f32 %v2284_v8, %v626_v61 }
 0x221   : > { %v2285_v10 = vpop.f32.mrb[6].mxu1  ;;  %v726_v14 = vadd.f32 %v725_v9, %v626_v61  ;;  %2359 = vmatpush3.bf16.msra.mxu0 %v2538_v39 }
 0x222   : > { %v737_v12 = vadd.f32 %v2285_v10, %v626_v61  ;;  %v728_v13 = vpop.f32.mrb[7].mxu1  ;;  %2360 = vmatprep.subr.bf16.mxu0 %v2539_v40 }
 0x223   : > { %v729_v15 = vadd.f32 %v728_v13, %v626_v61 }
 0x224   : > { %v775_v17 = vpack.c.bf16 %v737_v12, %v734_v11 }
 0x225   : > { %v774_v18 = vpack.c.bf16 %v729_v15, %v726_v14  ;;  %2361 = vmatpush3.bf16.msra.mxu0 %v2539_v40 }
 0x226   : > { %2362 = vmatprep.subr.bf16.mxu0 %v2540_v41 }
 0x227   : > { %v2288_v19 = vpop.f32.mrb[8].mxu1  ;;  %2314 = vmatprep.mubr.bf16.mxu0 %v774_v18  ;;  %v2545_v18 = vld [vmem:[#allocation2 + $0x170] ss:$8 sps:$4 sm:$0xff]  }
 0x228   : > { %v741_v20 = vpop.f32.mrb[9].mxu1  ;;  %2315 = vmatmul.mubr.bf16.gmra.mrb[20].mxu0 %v775_v17  ;;  %v750_v22 = vadd.f32 %v2288_v19, %v626_v61  ;;  %v2544_v17 = vld [vmem:[#allocation2 + $0x160] ss:$8 sps:$4 sm:$0xff]   ;;  %v935_v19 = vsub.s32 1, %v2784_v57 }
 0x229   : > { %v2289_v21 = vpop.f32.mrb[10].mxu1  ;;  %v742_v25 = vadd.f32 %v741_v20, %v626_v61  ;;  %2363 = vmatpush3.bf16.msra.mxu0 %v2540_v41 }
 0x22a   : > { %v753_v23 = vadd.f32 %v2289_v21, %v626_v61  ;;  %v744_v24 = vpop.f32.mrb[11].mxu1  ;;  %2364 = vmatprep.subr.bf16.mxu0 %v2541_v42  ;;  %v936_v20 = vrot.slane %v622_v59, %v935_v19 }
 0x22b   : > { %v745_v26 = vadd.f32 %v744_v24, %v626_v61 }
 0x22c   : > { %v777_v27 = vpack.c.bf16 %v753_v23, %v750_v22 }
 0x22d   : > { %v776_v28 = vpack.c.bf16 %v745_v26, %v742_v25  ;;  %2365 = vmatpush3.bf16.msra.mxu0 %v2541_v42 }
 0x22e   : > { %2366 = vmatprep.subr.bf16.mxu0 %v2542_v43 }
 0x22f   : > { %v2292_v29 = vpop.f32.mrb[12].mxu1  ;;  %2318 = vmatprep.mubr.bf16.mxu0 %v776_v28 }
 0x230   : > { %v757_v30 = vpop.f32.mrb[13].mxu1  ;;  %2319 = vmatmul.mubr.bf16.gmra.mrb[24].mxu0 %v777_v27  ;;  %v766_v32 = vadd.f32 %v2292_v29, %v626_v61 }
 0x231   : > { %v2293_v31 = vpop.f32.mrb[14].mxu1  ;;  %v758_v35 = vadd.f32 %v757_v30, %v626_v61  ;;  %2367 = vmatpush3.bf16.msra.mxu0 %v2542_v43 }
 0x232   : > { %v769_v33 = vadd.f32 %v2293_v31, %v626_v61  ;;  %v760_v34 = vpop.f32.mrb[15].mxu1  ;;  %2368 = vmatprep.subr.bf16.mxu0 %v2543_v44 }
 0x233   : > { %v761_v36 = vadd.f32 %v760_v34, %v626_v61 }
 0x234   : > { %v779_v37 = vpack.c.bf16 %v769_v33, %v766_v32 }
 0x235   : > { %v778_v38 = vpack.c.bf16 %v761_v36, %v758_v35  ;;  %2369 = vmatpush3.bf16.msra.mxu0 %v2543_v44 }
 0x236   : > { %2370 = vmatprep.subr.bf16.mxu0 %v2544_v17 }
 0x237   : > { %2322 = vmatprep.mubr.bf16.mxu0 %v778_v38 }
 0x238   : > { %2323 = vmatmul.mubr.bf16.gmra.mrb[28].mxu0 %v779_v37 }
 0x239   : > { %2371 = vmatpush3.bf16.msra.mxu0 %v2544_v17 }
 0x23a   : > { %2372 = vmatprep.subr.bf16.mxu0 %v2545_v18 }
 0x23d   : > { %2373 = vmatpush3.bf16.msra.mxu0 %v2545_v18 }
 0x2f3   : > { %v2312_v45 = vpop.f32.mrb[16].mxu0 }
 0x2f4   : > { %v862_v46 = vpop.f32.mrb[17].mxu0 }
 0x2f5   : > { %v2313_v54 = vpop.f32.mrb[18].mxu0 }
 0x2f6   : > { %v926_v55 = vpack.c.bf16 %v2313_v54, %v2312_v45  ;;  %v865_v60 = vpop.f32.mrb[19].mxu0 }
 0x2f7   : > { %v925_v61 = vpack.c.bf16 %v865_v60, %v862_v46 }
 0x2f9   : > { %2326 = vmatprep.subr.bf16.mxu1 %v925_v61 }
 0x2fa   : > { %2327 = vmatpush3.bf16.msra.mxu1 %v925_v61 }
 0x2fb   : > { %v2316_v62 = vpop.f32.mrb[20].mxu0  ;;  %2328 = vmatprep.subr.bf16.mxu1 %v926_v55 }
 0x2fc   : > { %v878_v63 = vpop.f32.mrb[21].mxu0 }
 0x2fd   : > { %v2317_v0 = vpop.f32.mrb[22].mxu0 }
 0x2fe   : > { %v928_v1 = vpack.c.bf16 %v2317_v0, %v2316_v62  ;;  %v881_v2 = vpop.f32.mrb[23].mxu0  ;;  %2329 = vmatpush3.bf16.msra.mxu1 %v926_v55 }
 0x2ff   : > { %v927_v3 = vpack.c.bf16 %v881_v2, %v878_v63 }
 0x301   : > { %2330 = vmatprep.subr.bf16.mxu1 %v927_v3 }
 0x302   : > { %2331 = vmatpush3.bf16.msra.mxu1 %v927_v3 }
 0x303   : > { %v2320_v4 = vpop.f32.mrb[24].mxu0  ;;  %2332 = vmatprep.subr.bf16.mxu1 %v928_v1 }
 0x304   : > { %v894_v5 = vpop.f32.mrb[25].mxu0 }
 0x305   : > { %v2321_v6 = vpop.f32.mrb[26].mxu0 }
 0x306   : > { %v930_v7 = vpack.c.bf16 %v2321_v6, %v2320_v4  ;;  %v897_v8 = vpop.f32.mrb[27].mxu0  ;;  %2333 = vmatpush3.bf16.msra.mxu1 %v928_v1 }
 0x307   : > { %v929_v9 = vpack.c.bf16 %v897_v8, %v894_v5 }
 0x309   : > { %2334 = vmatprep.subr.bf16.mxu1 %v929_v9 }
 0x30a   : > { %2335 = vmatpush3.bf16.msra.mxu1 %v929_v9 }
 0x30b   : > { %v2324_v10 = vpop.f32.mrb[28].mxu0  ;;  %2336 = vmatprep.subr.bf16.mxu1 %v930_v7 }
 0x30c   : > { %v910_v11 = vpop.f32.mrb[29].mxu0 }
 0x30d   : > { %v2325_v12 = vpop.f32.mrb[30].mxu0 }
 0x30e   : > { %v932_v13 = vpack.c.bf16 %v2325_v12, %v2324_v10  ;;  %v913_v14 = vpop.f32.mrb[31].mxu0  ;;  %2337 = vmatpush3.bf16.msra.mxu1 %v930_v7 }
 0x30f   : > { %v931_v15 = vpack.c.bf16 %v913_v14, %v910_v11 }
 0x311   : > { %2338 = vmatprep.subr.bf16.mxu1 %v931_v15 }
 0x312   : > { %2339 = vmatpush3.bf16.msra.mxu1 %v931_v15 }
 0x313   : > { %2340 = vmatprep.subr.bf16.mxu1 %v932_v13 }
 0x316   : > { %2341 = vmatpush3.bf16.msra.mxu1 %v932_v13 }
 0x319   : > { %2343 = vmatmul.mubr.bf16.vlgmr.msra.gmra.mrb[16].mxu1 %v2755_v47 }
 0x31a   : > { %2346 = vmatprep.mubr.bf16.mxu1 %v2758_v48 }
 0x321   : > { %2347 = vmatmul.mubr.bf16.gmra.mrb[20].mxu1 %v2763_v49 }
 0x322   : > { %2350 = vmatprep.mubr.bf16.mxu1 %v2766_v50 }
 0x329   : > { %2351 = vmatmul.mubr.bf16.gmra.mrb[24].mxu1 %v2771_v51 }
 0x32a   : > { %2354 = vmatprep.mubr.bf16.mxu1 %v2774_v52 }
 0x331   : > { %2355 = vmatmul.mubr.bf16.gmra.mrb[28].mxu1 %v2779_v53 }
 0x332   : > { %2406 = vmatprep.mubr.bf16.mxu1 %v2751_v16 }
 0x3ec   : > { %v2344_v21 = vpop.f32.mrb[16].mxu1 }
 0x3ed   : > { %v971_v22 = vpop.f32.mrb[17].mxu1  ;;  %v980_v24 = vadd.f32 %v2344_v21, %v936_v20 }
 0x3ee   : > { %v2345_v23 = vpop.f32.mrb[18].mxu1  ;;  %v972_v27 = vadd.f32 %v971_v22, %v936_v20 }
 0x3ef   : > { %v983_v25 = vadd.f32 %v2345_v23, %v936_v20  ;;  %v974_v26 = vpop.f32.mrb[19].mxu1 }
 0x3f0   : > { %v975_v28 = vadd.f32 %v974_v26, %v936_v20 }
 0x3f1   : > { %v1035_v16 = vpack.c.bf16 %v983_v25, %v980_v24 }
 0x3f2   : > { %v1034_v29 = vpack.c.bf16 %v975_v28, %v972_v27 }
 0x3f4   : > { %v2348_v30 = vpop.f32.mrb[20].mxu1  ;;  %2374 = vmatprep.mubr.bf16.mxu0 %v1034_v29  ;;  %v2654_v29 = vmov 0.0  }
 0x3f5   : > { %v987_v31 = vpop.f32.mrb[21].mxu1  ;;  %2375 = vmatmul.mubr.bf16.vlgmr.msra.gmra.mrb[32].mxu0 %v1035_v16  ;;  %v996_v33 = vadd.f32 %v2348_v30, %v936_v20  ;;  %2422 = vmatprep.subr.bf16.mxu0 %v2654_v29  ;;  %v2829_v30 = vld [vmem:[#allocation2 + $0x400] sm:$0x2] }
 0x3f6   : > { %v2349_v32 = vpop.f32.mrb[22].mxu1  ;;  %v988_v58 = vadd.f32 %v987_v31, %v936_v20  ;;  %v1195_v31 = vunpack.c.l.bf16 %v2829_v30  ;;  %v2590_v30 = vld [vmem:[#allocation2 + $0x2d0] ss:$8 sps:$4 sm:$0xff]  }
 0x3f7   : > { %v999_v34 = vadd.f32 %v2349_v32, %v936_v20  ;;  %v990_v35 = vpop.f32.mrb[23].mxu1  ;;  %v1198_v32 = vsub.s32 2, %v2784_v57 }
 0x3f8   : > { %v991_v59 = vadd.f32 %v990_v35, %v936_v20 }
 0x3f9   : > { %v1037_v36 = vpack.c.bf16 %v999_v34, %v996_v33  ;;  %v1199_v33 = vrot.slane %v1195_v31, %v1198_v32  ;;  %v2554_v32 = vld [vmem:[#allocation2 + $0x1f0] ss:$8 sps:$4 sm:$0xff]  }
 0x3fa   : > { %v1036_v37 = vpack.c.bf16 %v991_v59, %v988_v58 }
 0x3fc   : > { %v2352_v38 = vpop.f32.mrb[24].mxu1  ;;  %2378 = vmatprep.mubr.bf16.mxu0 %v1036_v37 }
 0x3fd   : > { %v1003_v39 = vpop.f32.mrb[25].mxu1  ;;  %2379 = vmatmul.mubr.bf16.gmra.mrb[36].mxu0 %v1037_v36  ;;  %v1012_v41 = vadd.f32 %v2352_v38, %v936_v20 }
 0x3fe   : > { %v2353_v40 = vpop.f32.mrb[26].mxu1  ;;  %v1004_v44 = vadd.f32 %v1003_v39, %v936_v20 }
 0x3ff   : > { %v1015_v42 = vadd.f32 %v2353_v40, %v936_v20  ;;  %v1006_v43 = vpop.f32.mrb[27].mxu1 }
 0x400   : > { %v1007_v45 = vadd.f32 %v1006_v43, %v936_v20 }
 0x401   : > { %v1039_v46 = vpack.c.bf16 %v1015_v42, %v1012_v41 }
 0x402   : > { %v1038_v54 = vpack.c.bf16 %v1007_v45, %v1004_v44 }
 0x404   : > { %v2356_v55 = vpop.f32.mrb[28].mxu1  ;;  %2382 = vmatprep.mubr.bf16.mxu0 %v1038_v54 }
 0x405   : > { %v1019_v60 = vpop.f32.mrb[29].mxu1  ;;  %2383 = vmatmul.mubr.bf16.gmra.mrb[40].mxu0 %v1039_v46  ;;  %v1028_v62 = vadd.f32 %v2356_v55, %v936_v20 }
 0x406   : > { %v2357_v61 = vpop.f32.mrb[30].mxu1  ;;  %v1020_v1 = vadd.f32 %v1019_v60, %v936_v20 }
 0x407   : > { %v1031_v63 = vadd.f32 %v2357_v61, %v936_v20  ;;  %v1022_v0 = vpop.f32.mrb[31].mxu1 }
 0x408   : > { %v1023_v2 = vadd.f32 %v1022_v0, %v936_v20 }
 0x409   : > { %v1041_v3 = vpack.c.bf16 %v1031_v63, %v1028_v62 }
 0x40a   : > { %v1040_v4 = vpack.c.bf16 %v1023_v2, %v1020_v1 }
 0x40c   : > { %2386 = vmatprep.mubr.bf16.mxu0 %v1040_v4 }
 0x40d   : > { %2387 = vmatmul.mubr.bf16.gmra.mrb[44].mxu0 %v1041_v3 }
 0x40e   : > { %2438 = vmatprep.mubr.msk.bf16.mxu0 %vm2655_vm0, %v2654_v29 }
 0x4c8   : > { %v2376_v5 = vpop.f32.mrb[32].mxu0 }
 0x4c9   : > { %v1124_v6 = vpop.f32.mrb[33].mxu0 }
 0x4ca   : > { %v2377_v7 = vpop.f32.mrb[34].mxu0 }
 0x4cb   : > { %v1188_v8 = vpack.c.bf16 %v2377_v7, %v2376_v5  ;;  %v1127_v9 = vpop.f32.mrb[35].mxu0 }
 0x4cc   : > { %v1187_v10 = vpack.c.bf16 %v1127_v9, %v1124_v6 }
 0x4ce   : > { %2390 = vmatprep.subr.bf16.mxu1 %v1187_v10 }
 0x4cf   : > { %2391 = vmatpush3.bf16.msra.mxu1 %v1187_v10 }
 0x4d0   : > { %v2380_v11 = vpop.f32.mrb[36].mxu0  ;;  %2392 = vmatprep.subr.bf16.mxu1 %v1188_v8 }
 0x4d1   : > { %v1140_v12 = vpop.f32.mrb[37].mxu0 }
 0x4d2   : > { %v2381_v13 = vpop.f32.mrb[38].mxu0 }
 0x4d3   : > { %v1190_v14 = vpack.c.bf16 %v2381_v13, %v2380_v11  ;;  %v1143_v15 = vpop.f32.mrb[39].mxu0  ;;  %2393 = vmatpush3.bf16.msra.mxu1 %v1188_v8 }
 0x4d4   : > { %v1189_v17 = vpack.c.bf16 %v1143_v15, %v1140_v12 }
 0x4d6   : > { %2394 = vmatprep.subr.bf16.mxu1 %v1189_v17 }
 0x4d7   : > { %2395 = vmatpush3.bf16.msra.mxu1 %v1189_v17 }
 0x4d8   : > { %v2384_v18 = vpop.f32.mrb[40].mxu0  ;;  %2396 = vmatprep.subr.bf16.mxu1 %v1190_v14 }
 0x4d9   : > { %v1156_v19 = vpop.f32.mrb[41].mxu0 }
 0x4da   : > { %v2385_v20 = vpop.f32.mrb[42].mxu0 }
 0x4db   : > { %v1192_v21 = vpack.c.bf16 %v2385_v20, %v2384_v18  ;;  %v1159_v22 = vpop.f32.mrb[43].mxu0  ;;  %2397 = vmatpush3.bf16.msra.mxu1 %v1190_v14 }
 0x4dc   : > { %v1191_v23 = vpack.c.bf16 %v1159_v22, %v1156_v19 }
 0x4de   : > { %2398 = vmatprep.subr.bf16.mxu1 %v1191_v23 }
 0x4df   : > { %2399 = vmatpush3.bf16.msra.mxu1 %v1191_v23 }
 0x4e0   : > { %v2388_v24 = vpop.f32.mrb[44].mxu0  ;;  %2400 = vmatprep.subr.bf16.mxu1 %v1192_v21 }
 0x4e1   : > { %v1172_v25 = vpop.f32.mrb[45].mxu0 }
 0x4e2   : > { %v2389_v26 = vpop.f32.mrb[46].mxu0 }
 0x4e3   : > { %v1194_v27 = vpack.c.bf16 %v2389_v26, %v2388_v24  ;;  %v1175_v28 = vpop.f32.mrb[47].mxu0  ;;  %2401 = vmatpush3.bf16.msra.mxu1 %v1192_v21 }
 0x4e4   : > { %v1193_v16 = vpack.c.bf16 %v1175_v28, %v1172_v25 }
 0x4e6   : > { %2402 = vmatprep.subr.bf16.mxu1 %v1193_v16 }
 0x4e7   : > { %2403 = vmatpush3.bf16.msra.mxu1 %v1193_v16 }
 0x4e8   : > { %2404 = vmatprep.subr.bf16.mxu1 %v1194_v27 }
 0x4eb   : > { %2405 = vmatpush3.bf16.msra.mxu1 %v1194_v27 }
 0x4ec   : > { %2442 = vmatprep.subr.bf16.mxu1 %v2654_v29 }
 0x4ee   : > { %2407 = vmatmul.mubr.bf16.vlgmr.msra.gmra.mrb[32].mxu1 %v2755_v47  ;;  %v2547_v47 = vld [vmem:[#allocation2 + $0x180] ss:$8 sps:$4 sm:$0xff]  }
 0x4ef   : > { %2410 = vmatprep.mubr.bf16.mxu1 %v2758_v48  ;;  %2443 = vmatpush3.bf16.msra.mxu1 %v2547_v47  ;;  %v2548_v48 = vld [vmem:[#allocation2 + $0x190] ss:$8 sps:$4 sm:$0xff]  }
 0x4f0   : > { %2444 = vmatprep.subr.bf16.mxu1 %v2654_v29 }
 0x4f3   : > { %2445 = vmatpush3.bf16.msra.mxu1 %v2548_v48 }
 0x4f4   : > { %2446 = vmatprep.subr.bf16.mxu1 %v2654_v29 }
 0x4f6   : > { %2411 = vmatmul.mubr.bf16.gmra.mrb[36].mxu1 %v2763_v49  ;;  %v2549_v49 = vld [vmem:[#allocation2 + $0x1a0] ss:$8 sps:$4 sm:$0xff]  }
 0x4f7   : > { %2414 = vmatprep.mubr.bf16.mxu1 %v2766_v50  ;;  %2447 = vmatpush3.bf16.msra.mxu1 %v2549_v49  ;;  %v2550_v50 = vld [vmem:[#allocation2 + $0x1b0] ss:$8 sps:$4 sm:$0xff]  }
 0x4f8   : > { %2448 = vmatprep.subr.bf16.mxu1 %v2654_v29 }
 0x4fb   : > { %2449 = vmatpush3.bf16.msra.mxu1 %v2550_v50 }
 0x4fc   : > { %2450 = vmatprep.subr.bf16.mxu1 %v2654_v29 }
 0x4fe   : > { %2415 = vmatmul.mubr.bf16.gmra.mrb[40].mxu1 %v2771_v51  ;;  %v2551_v51 = vld [vmem:[#allocation2 + $0x1c0] ss:$8 sps:$4 sm:$0xff]  }
 0x4ff   : > { %2418 = vmatprep.mubr.bf16.mxu1 %v2774_v52  ;;  %2451 = vmatpush3.bf16.msra.mxu1 %v2551_v51  ;;  %v2552_v52 = vld [vmem:[#allocation2 + $0x1d0] ss:$8 sps:$4 sm:$0xff]  }
 0x500   : > { %2452 = vmatprep.subr.bf16.mxu1 %v2654_v29 }
 0x503   : > { %2453 = vmatpush3.bf16.msra.mxu1 %v2552_v52 }
 0x504   : > { %2454 = vmatprep.subr.bf16.mxu1 %v2654_v29 }
 0x506   : > { %2419 = vmatmul.mubr.bf16.gmra.mrb[44].mxu1 %v2779_v53  ;;  %v2553_v53 = vld [vmem:[#allocation2 + $0x1e0] ss:$8 sps:$4 sm:$0xff]  }
 0x507   : > { %2458 = vmatprep.mubr.msk.bf16.mxu1 %vm2655_vm0, %v2654_v29  ;;  %2455 = vmatpush3.bf16.msra.mxu1 %v2553_v53  ;;  %v2546_v53 = vld [vmem:[%s2816_s19] sm:$0xff]  }
 0x508   : > { %2456 = vmatprep.subr.bf16.mxu1 %v2654_v29 }
 0x50b   : > { %2457 = vmatpush3.bf16.msra.mxu1 %v2554_v32 }
 0x5c1   : > { %v2408_v34 = vpop.f32.mrb[32].mxu1 }
 0x5c2   : > { %v1243_v35 = vadd.f32 %v2408_v34, %v1199_v33  ;;  %v1234_v58 = vpop.f32.mrb[33].mxu1  ;;  %v2555_v34 = vld [vmem:[#allocation2 + $0x200] ss:$8 sps:$4 sm:$0xff]  }
 0x5c3   : > { %v1235_v59 = vadd.f32 %v1234_v58, %v1199_v33  ;;  %v2409_v36 = vpop.f32.mrb[34].mxu1  ;;  %v2558_v58 = vld [vmem:[#allocation2 + $0x210] ss:$8 sps:$4 sm:$0xff]  }
 0x5c4   : > { %v1246_v37 = vadd.f32 %v2409_v36, %v1199_v33  ;;  %v1237_v38 = vpop.f32.mrb[35].mxu1  ;;  %v1299_v40 = vmax.f32 %v1243_v35, 0.0  ;;  %v2557_v35 = vld [vmem:[#allocation2 + $0x204] ss:$8 sps:$4 sm:$0xff]   ;;  %v2561_v36 = vld [vmem:[#allocation2 + $0x220] ss:$8 sps:$4 sm:$0xff]  }
 0x5c5   : > { %v1238_v39 = vadd.f32 %v1237_v38, %v1199_v33  ;;  %v1297_v42 = vmax.f32 %v1235_v59, 0.0  ;;  %v2563_v59 = vld [vmem:[#allocation2 + $0x224] ss:$8 sps:$4 sm:$0xff]   ;;  %v2564_v38 = vld [vmem:[#allocation2 + $0x230] ss:$8 sps:$4 sm:$0xff]  }
 0x5c6   : > { %v1300_v41 = vmax.f32 %v1246_v37, 0.0  ;;  %v2566_v37 = vld [vmem:[#allocation2 + $0x234] ss:$8 sps:$4 sm:$0xff]  }
 0x5c7   : > { %v1298_v43 = vmax.f32 %v1238_v39, 0.0  ;;  %v2569_v39 = vld [vmem:[#allocation2 + $0x244] ss:$8 sps:$4 sm:$0xff]  }
 0x5c8   : > { %v1314_v44 = vpack.c.bf16 %v1300_v41, %v1299_v40  ;;  %v2567_v40 = vld [vmem:[#allocation2 + $0x240] ss:$8 sps:$4 sm:$0xff]   ;;  %v2572_v41 = vld [vmem:[#allocation2 + $0x254] ss:$8 sps:$4 sm:$0xff]  }
 0x5c9   : > { %v1313_v45 = vpack.c.bf16 %v1298_v43, %v1297_v42  ;;  %v2412_v46 = vpop.f32.mrb[36].mxu1  ;;  %v2570_v42 = vld [vmem:[#allocation2 + $0x250] ss:$8 sps:$4 sm:$0xff]  }
 0x5ca   : > { %v1259_v54 = vadd.f32 %v2412_v46, %v1199_v33  ;;  %v1250_v55 = vpop.f32.mrb[37].mxu1 }
 0x5cb   : > { %v1251_v60 = vadd.f32 %v1250_v55, %v1199_v33  ;;  %v2413_v61 = vpop.f32.mrb[38].mxu1  ;;  %2423 = vmatpush3.bf16.msra.mxu0 %v1313_v45  ;;  %v2575_v55 = vld [vmem:[#allocation2 + $0x264] ss:$8 sps:$4 sm:$0xff]  }
 0x5cc   : > { %v1262_v62 = vadd.f32 %v2413_v61, %v1199_v33  ;;  %v1253_v63 = vpop.f32.mrb[39].mxu1  ;;  %2424 = vmatprep.subr.bf16.mxu0 %v2654_v29  ;;  %v1303_v1 = vmax.f32 %v1259_v54, 0.0  ;;  %v2578_v61 = vld [vmem:[#allocation2 + $0x274] ss:$8 sps:$4 sm:$0xff]  }
 0x5cd   : > { %v1254_v0 = vadd.f32 %v1253_v63, %v1199_v33  ;;  %v1301_v3 = vmax.f32 %v1251_v60, 0.0  ;;  %v2573_v60 = vld [vmem:[#allocation2 + $0x260] ss:$8 sps:$4 sm:$0xff]   ;;  %v2656_v63 = vmov 0  }
 0x5ce   : > { %v1304_v2 = vmax.f32 %v1262_v62, 0.0  ;;  %v2576_v62 = vld [vmem:[#allocation2 + $0x270] ss:$8 sps:$4 sm:$0xff]  }
 0x5cf   : > { %v1302_v4 = vmax.f32 %v1254_v0, 0.0  ;;  %2425 = vmatpush3.bf16.msra.mxu0 %v1314_v44  ;;  %v2579_v0 = vld [vmem:[#allocation2 + $0x300] ss:$8 sps:$4 sm:$0xff]  }
 0x5d0   : > { %v1316_v5 = vpack.c.bf16 %v1304_v2, %v1303_v1  ;;  %2426 = vmatprep.subr.bf16.mxu0 %v2654_v29  ;;  %v2580_v1 = vld [vmem:[#allocation2 + $0x280] ss:$8 sps:$4 sm:$0xff]   ;;  %v2581_v2 = vld [vmem:[#allocation2 + $0x310] ss:$8 sps:$4 sm:$0xff]   ;;  %2199 = vmatprep.subr.bf16.mxu1 %v2579_v0 }
 0x5d1   : > { %v1315_v6 = vpack.c.bf16 %v1302_v4, %v1301_v3  ;;  %v2416_v7 = vpop.f32.mrb[40].mxu1  ;;  %v2582_v3 = vld [vmem:[#allocation2 + $0x290] ss:$8 sps:$4 sm:$0xff]   ;;  %v2583_v4 = vld [vmem:[#allocation2 + $0x320] ss:$8 sps:$4 sm:$0xff]  }
 0x5d2   : > { %v1275_v8 = vadd.f32 %v2416_v7, %v1199_v33  ;;  %v1266_v9 = vpop.f32.mrb[41].mxu1  ;;  %v2586_v7 = vld [vmem:[#allocation2 + $0x2b0] ss:$8 sps:$4 sm:$0xff]   ;;  %v419_v0 = vld [vmem:[#allocation2 + $0x400] sm:$0x4] }
 0x5d3   : > { %v1267_v10 = vadd.f32 %v1266_v9, %v1199_v33  ;;  %v2417_v11 = vpop.f32.mrb[42].mxu1  ;;  %2427 = vmatpush3.bf16.msra.mxu0 %v1315_v6  ;;  %v2585_v6 = vld [vmem:[#allocation2 + $0x330] ss:$8 sps:$4 sm:$0xff]   ;;  %v2588_v9 = vld [vmem:[#allocation2 + $0x2c0] ss:$8 sps:$4 sm:$0xff]  }
 0x5d4   : > { %v1278_v12 = vadd.f32 %v2417_v11, %v1199_v33  ;;  %v1269_v13 = vpop.f32.mrb[43].mxu1  ;;  %2428 = vmatprep.subr.bf16.mxu0 %v2654_v29  ;;  %v1307_v15 = vmax.f32 %v1275_v8, 0.0  ;;  %v2587_v8 = vld [vmem:[#allocation2 + $0x340] ss:$8 sps:$4 sm:$0xff]  }
 0x5d5   : > { %v1270_v14 = vadd.f32 %v1269_v13, %v1199_v33  ;;  %v1305_v18 = vmax.f32 %v1267_v10, 0.0  ;;  %v1371_v10 = vsub.s32 3, %v2784_v57 }
 0x5d6   : > { %v1308_v17 = vmax.f32 %v1278_v12, 0.0 }
 0x5d7   : > { %v1306_v19 = vmax.f32 %v1270_v14, 0.0  ;;  %2429 = vmatpush3.bf16.msra.mxu0 %v1316_v5  ;;  %v2584_v5 = vld [vmem:[#allocation2 + $0x2a0] ss:$8 sps:$4 sm:$0xff]   ;;  %v1372_v11 = vrot.slane %v1195_v31, %v1371_v10 }
 0x5d8   : > { %v1318_v20 = vpack.c.bf16 %v1308_v17, %v1307_v15  ;;  %2430 = vmatprep.subr.bf16.mxu0 %v2654_v29  ;;  %v2591_v31 = vld [vmem:[#allocation2 + $0x360] ss:$8 sps:$4 sm:$0xff]  }
 0x5d9   : > { %v1317_v21 = vpack.c.bf16 %v1306_v19, %v1305_v18  ;;  %v2420_v22 = vpop.f32.mrb[44].mxu1 }
 0x5da   : > { %v1291_v23 = vadd.f32 %v2420_v22, %v1199_v33  ;;  %v1282_v24 = vpop.f32.mrb[45].mxu1 }
 0x5db   : > { %v1283_v25 = vadd.f32 %v1282_v24, %v1199_v33  ;;  %v2421_v26 = vpop.f32.mrb[46].mxu1  ;;  %2431 = vmatpush3.bf16.msra.mxu0 %v1317_v21  ;;  %v2589_v24 = vld [vmem:[#allocation2 + $0x350] ss:$8 sps:$4 sm:$0xff]  }
 0x5dc   : > { %v1294_v27 = vadd.f32 %v2421_v26, %v1199_v33  ;;  %v1285_v28 = vpop.f32.mrb[47].mxu1  ;;  %2432 = vmatprep.subr.bf16.mxu0 %v2654_v29  ;;  %v1311_v47 = vmax.f32 %v1291_v23, 0.0  ;;  %v2593_v26 = vld [vmem:[#allocation2 + $0x370] ss:$8 sps:$4 sm:$0xff]  }
 0x5dd   : > { %v1286_v16 = vadd.f32 %v1285_v28, %v1199_v33  ;;  %v1309_v49 = vmax.f32 %v1283_v25, 0.0  ;;  %v2560_v33 = vld [vmem:[#allocation2 + $0x214] ss:$8 sps:$4 sm:$0xff]   ;;  %v2592_v25 = vld [vmem:[#allocation2 + $0x2e0] ss:$8 sps:$4 sm:$0xff]  }
 0x5de   : > { %v1312_v48 = vmax.f32 %v1294_v27, 0.0  ;;  %v2594_v27 = vld [vmem:[#allocation2 + $0x2f0] ss:$8 sps:$4 sm:$0xff]   ;;  %v2595_v28 = vld [vmem:[#allocation2 + $0x380] ss:$8 sps:$4 sm:$0xff]  }
 0x5df   : > { %v1310_v50 = vmax.f32 %v1286_v16, 0.0  ;;  %2433 = vmatpush3.bf16.msra.mxu0 %v1318_v20  ;;  %v2596_v16 = vld [vmem:[#allocation2 + $0x390] ss:$8 sps:$4 sm:$0xff]  }
 0x5e0   : > { %v1320_v51 = vpack.c.bf16 %v1312_v48, %v1311_v47  ;;  %2434 = vmatprep.subr.bf16.mxu0 %v2654_v29  ;;  %v2597_v47 = vld [vmem:[#allocation2 + $0x3a0] ss:$8 sps:$4 sm:$0xff]   ;;  %v2598_v48 = vld [vmem:[#allocation2 + $0x3b0] ss:$8 sps:$4 sm:$0xff]  }
 0x5e1   : > { %v1319_v52 = vpack.c.bf16 %v1310_v50, %v1309_v49  ;;  %v2599_v49 = vld [vmem:[#allocation2 + $0x3c0] ss:$8 sps:$4 sm:$0xff]  }
 0x5e2   : > { %v418_v50 = vld [vmem:[#allocation2 + $0x400] sm:$0x44] }
 0x5e3   : > { %2435 = vmatpush3.bf16.msra.mxu0 %v1319_v52  ;;  %v1473_v52 = vsub.s32 4, %v2784_v57 }
 0x5e4   : > { %2436 = vmatprep.subr.bf16.mxu0 %v2654_v29 }
 0x5e7   : > { %2437 = vmatpush3.bf16.msra.mxu0 %v1320_v51  ;;  %v1469_v51 = vunpack.c.l.bf16 %v418_v50 }
 0x5e8   : > { %1559 = vmatprep.subr.bf16.mxu0 %v2557_v35 }
 0x5e9   : > { %v1474_v32 = vrot.slane %v1469_v51, %v1473_v52 }
 0x5ea   : > { %2439 = vmatmul.mubr.bf16.vlgmr.msra.gmra.mrb[48].mxu0 %v2546_v53  ;;  %v1470_v53 = vunpack.c.h.bf16 %v418_v50 }
 0x5eb   : > { %1560 = vmatpush1.bf16.msra.mxu0 %v2555_v34  ;;  %1591 = vmatprep.mubr.bf16.mxu0 %v2656_v63  ;;  %v2602_v63 = vld [vmem:[#allocation2 + $0x3f0] ss:$8 sps:$4 sm:$0xff]  }
 0x5ec   : > { %1561 = vmatprep.subr.bf16.mxu0 %v2560_v33  ;;  %v1478_v34 = vrot.slane %v1470_v53, %v1473_v52 }
 0x5ef   : > { %1562 = vmatpush1.bf16.msra.mxu0 %v2558_v58 }
 0x5f0   : > { %1563 = vmatprep.subr.bf16.mxu0 %v2563_v59 }
 0x5f3   : > { %1564 = vmatpush1.bf16.msra.mxu0 %v2561_v36 }
 0x5f4   : > { %1565 = vmatprep.subr.bf16.mxu0 %v2566_v37 }
 0x5f7   : > { %1566 = vmatpush1.bf16.msra.mxu0 %v2564_v38 }
 0x5f8   : > { %1567 = vmatprep.subr.bf16.mxu0 %v2569_v39 }
 0x5fb   : > { %1568 = vmatpush1.bf16.msra.mxu0 %v2567_v40 }
 0x5fc   : > { %1569 = vmatprep.subr.bf16.mxu0 %v2572_v41 }
 0x5ff   : > { %1570 = vmatpush1.bf16.msra.mxu0 %v2570_v42 }
 0x600   : > { %1571 = vmatprep.subr.bf16.mxu0 %v2575_v55 }
 0x603   : > { %1572 = vmatpush1.bf16.msra.mxu0 %v2573_v60 }
 0x604   : > { %1573 = vmatprep.subr.bf16.mxu0 %v2578_v61  ;;  %v2600_v61 = vld [vmem:[#allocation2 + $0x3d0] ss:$8 sps:$4 sm:$0xff]  }
 0x607   : > { %1574 = vmatpush1.bf16.msra.mxu0 %v2576_v62  ;;  %v2601_v62 = vld [vmem:[#allocation2 + $0x3e0] ss:$8 sps:$4 sm:$0xff]  }
 0x608   : > { %2462 = vmatprep.subr.bf16.mxu0 %v2654_v29 }
 0x6bd   : > { %v1361_v43 = vpop.f32.mrb[48].mxu0 }
 0x6be   : > { %v2440_v44 = vpop.f32.mrb[49].mxu0 }
 0x6bf   : > { %v1364_v45 = vpop.f32.mrb[50].mxu0 }
 0x6c0   : > { %v1368_v46 = vpack.c.bf16 %v1364_v45, %v1361_v43  ;;  %v2441_v54 = vpop.f32.mrb[51].mxu0 }
 0x6c2   : > { %2459 = vmatmul.mubr.bf16.vlgmr.msra.gmra.mrb[48].mxu1 %v1368_v46 }
 0x6c3   : > { %2200 = vmatpush3.bf16.msra.mxu1 %v2580_v1  ;;  %v1616_v1 = vunpack.c.l.bf16 %v419_v0 }
 0x6c4   : > { %2201 = vmatprep.subr.bf16.mxu1 %v2581_v2  ;;  %v1619_v2 = vsub.s32 5, %v2784_v57 }
 0x6c7   : > { %2202 = vmatpush3.bf16.msra.mxu1 %v2582_v3 }
 0x6c8   : > { %2203 = vmatprep.subr.bf16.mxu1 %v2583_v4  ;;  %v1620_v4 = vrot.slane %v1616_v1, %v1619_v2 }
 0x6cb   : > { %2204 = vmatpush3.bf16.msra.mxu1 %v2584_v5 }
 0x6cc   : > { %2205 = vmatprep.subr.bf16.mxu1 %v2585_v6 }
 0x6cf   : > { %2206 = vmatpush3.bf16.msra.mxu1 %v2586_v7 }
 0x6d0   : > { %2207 = vmatprep.subr.bf16.mxu1 %v2587_v8 }
 0x6d3   : > { %2208 = vmatpush3.bf16.msra.mxu1 %v2588_v9 }
 0x6d4   : > { %2209 = vmatprep.subr.bf16.mxu1 %v2589_v24 }
 0x6d7   : > { %2210 = vmatpush3.bf16.msra.mxu1 %v2590_v30 }
 0x6d8   : > { %2211 = vmatprep.subr.bf16.mxu1 %v2591_v31 }
 0x6db   : > { %2212 = vmatpush3.bf16.msra.mxu1 %v2592_v25 }
 0x6dc   : > { %2213 = vmatprep.subr.bf16.mxu1 %v2593_v26 }
 0x6df   : > { %2214 = vmatpush3.bf16.msra.mxu1 %v2594_v27 }
 0x795   : > { %v1455_v12 = vpop.f32.mrb[48].mxu1 }
 0x796   : > { %v1456_v13 = vadd.f32 %v1455_v12, %v1372_v11  ;;  %v2460_v14 = vpop.f32.mrb[49].mxu1 }
 0x797   : > { %v1458_v15 = vpop.f32.mrb[50].mxu1 }
 0x798   : > { %v1464_v17 = vmul.f32 0.01, %v1456_v13  ;;  %v1459_v18 = vadd.f32 %v1458_v15, %v1372_v11  ;;  %v2461_v19 = vpop.f32.mrb[51].mxu1  ;;  %vm1462_vm1 = vcmp.gt.f32.partialorder %v1456_v13, 0.0 }
 0x799   : > { %v1768_v19 = vsub.s32 6, %v2784_v57 }
 0x79a   : > { %vm1463_vm2 = vcmp.gt.f32.partialorder %v1459_v18, 0.0  ;;  %v1465_v20 = vmul.f32 0.01, %v1459_v18  ;;  %v1466_v21 = vsel %vm1462_vm1, %v1456_v13, %v1464_v17  ;;  %v420_v17 = vld [vmem:[#allocation2 + $0x400] sm:$0x8] }
 0x79c   : > { %v1467_v22 = vsel %vm1463_vm2, %v1459_v18, %v1465_v20  ;;  %v1765_v18 = vunpack.c.l.bf16 %v420_v17  ;;  %v1860_v20 = vand.u32 127, %v623_v56 }
 0x79d   : > { %v1468_v23 = vpack.c.bf16 %v1467_v22, %v1466_v21 }
 0x79e   : > { %v1769_v21 = vrot.slane %v1765_v18, %v1768_v19  ;;  %vm1861_vm9 = vcmp.lt.s32.totalorder %v1860_v20, 5 }
 0x79f   : > { %1592 = vmatmul.mubr.bf16.vlgmr.msra.gmra.mrb[52].mxu0 %v1468_v23 }
 0x7a0   : > { %2478 = vmatprep.mubr.msk.bf16.mxu0 %vm2655_vm0, %v2654_v29  ;;  %2463 = vmatpush3.bf16.msra.mxu0 %v2595_v28 }
 0x7a1   : > { %2464 = vmatprep.subr.bf16.mxu0 %v2654_v29 }
 0x7a4   : > { %2465 = vmatpush3.bf16.msra.mxu0 %v2596_v16 }
 0x7a5   : > { %2466 = vmatprep.subr.bf16.mxu0 %v2654_v29 }
 0x7a8   : > { %2467 = vmatpush3.bf16.msra.mxu0 %v2597_v47 }
 0x7a9   : > { %2468 = vmatprep.subr.bf16.mxu0 %v2654_v29 }
 0x7ac   : > { %2469 = vmatpush3.bf16.msra.mxu0 %v2598_v48 }
 0x7ad   : > { %2470 = vmatprep.subr.bf16.mxu0 %v2654_v29 }
 0x7b0   : > { %2471 = vmatpush3.bf16.msra.mxu0 %v2599_v49 }
 0x7b1   : > { %2472 = vmatprep.subr.bf16.mxu0 %v2654_v29 }
 0x7b4   : > { %2473 = vmatpush3.bf16.msra.mxu0 %v2600_v61 }
 0x7b5   : > { %2474 = vmatprep.subr.bf16.mxu0 %v2654_v29 }
 0x7b8   : > { %2475 = vmatpush3.bf16.msra.mxu0 %v2601_v62 }
 0x7b9   : > { %2476 = vmatprep.subr.bf16.mxu0 %v2654_v29 }
 0x7bc   : > { %2477 = vmatpush3.bf16.msra.mxu0 %v2602_v63 }
 0x872   : > { %v1593_v35 = vpop.f32.mrb[52].mxu0 }
 0x873   : > { %v1594_v33 = vadd.f32 %v1593_v35, %v1474_v32  ;;  %v1595_v58 = vpop.f32.mrb[53].mxu0 }
 0x874   : > { %v1596_v59 = vadd.f32 %v1595_v58, %v1478_v34  ;;  %v1597_v36 = vpop.f32.mrb[54].mxu0 }
 0x875   : > { %v1606_v37 = vmul.f32 0.01, %v1594_v33  ;;  %v1598_v38 = vadd.f32 %v1597_v36, %v1474_v32  ;;  %v1599_v39 = vpop.f32.mrb[55].mxu0  ;;  %vm1602_vm3 = vcmp.gt.f32.partialorder %v1594_v33, 0.0 }
 0x876   : > { %v1607_v40 = vmul.f32 0.01, %v1596_v59  ;;  %v1600_v41 = vadd.f32 %v1599_v39, %v1478_v34  ;;  %vm1603_vm4 = vcmp.gt.f32.partialorder %v1596_v59, 0.0 }
 0x877   : > { %vm1604_vm5 = vcmp.gt.f32.partialorder %v1598_v38, 0.0  ;;  %v1608_v42 = vmul.f32 0.01, %v1598_v38  ;;  %v1610_v44 = vsel %vm1602_vm3, %v1594_v33, %v1606_v37 }
 0x878   : > { %vm1605_vm6 = vcmp.gt.f32.partialorder %v1600_v41, 0.0  ;;  %v1609_v43 = vmul.f32 0.01, %v1600_v41  ;;  %v1611_v54 = vsel %vm1603_vm4, %v1596_v59, %v1607_v40 }
 0x879   : > { %v1612_v45 = vsel %vm1604_vm5, %v1598_v38, %v1608_v42 }
 0x87a   : > { %v1614_v46 = vpack.c.bf16 %v1612_v45, %v1610_v44  ;;  %v1613_v55 = vsel %vm1605_vm6, %v1600_v41, %v1609_v43 }
 0x87b   : > { %v1615_v60 = vpack.c.bf16 %v1613_v55, %v1611_v54 }
 0x87d   : > { %1749 = vmatprep.mubr.bf16.mxu1 %v1615_v60 }
 0x87e   : > { %1750 = vmatmul.mubr.bf16.vlgmr.msra.gmra.mrb[52].mxu1 %v1614_v46 }
 0x951   : > { %v2215_v3 = vpop.f32.mrb[52].mxu1 }
 0x952   : > { %v2216_v5 = vpop.f32.mrb[53].mxu1 }
 0x953   : > { %v2217_v6 = vadd.f32 %v2216_v5, %v2215_v3  ;;  %v2218_v7 = vpop.f32.mrb[54].mxu1 }
 0x954   : > { %v2219_v8 = vpop.f32.mrb[55].mxu1 }
 0x955   : > { %v1752_v9 = vadd.f32 %v2217_v6, %v1620_v4  ;;  %v2220_v10 = vadd.f32 %v2219_v8, %v2218_v7 }
 0x957   : > { %v1760_v11 = vmul.f32 0.01, %v1752_v9  ;;  %v1755_v12 = vadd.f32 %v2220_v10, %v1620_v4  ;;  %vm1758_vm7 = vcmp.gt.f32.partialorder %v1752_v9, 0.0 }
 0x959   : > { %vm1759_vm8 = vcmp.gt.f32.partialorder %v1755_v12, 0.0  ;;  %v1761_v13 = vmul.f32 0.01, %v1755_v12  ;;  %v1762_v29 = vsel %vm1758_vm7, %v1752_v9, %v1760_v11 }
 0x95b   : > { %v1763_v14 = vsel %vm1759_vm8, %v1755_v12, %v1761_v13 }
 0x95c   : > { %v1764_v15 = vpack.c.bf16 %v1763_v14, %v1762_v29 }
 0x95e   : > { %2479 = vmatmul.mubr.bf16.vlgmr.msra.gmra.mrb[56].mxu0 %v1764_v15 }
 0xa31   : > { %v1852_v22 = vpop.f32.mrb[56].mxu0 }
 0xa32   : > { %v1853_v23 = vadd.f32 %v1852_v22, %v1769_v21  ;;  %v2480_v24 = vpop.f32.mrb[57].mxu0 }
 0xa33   : > { %v1855_v30 = vpop.f32.mrb[58].mxu0 }
 0xa34   : > { %v1856_v31 = vadd.f32 %v1855_v30, %v1769_v21  ;;  %v2481_v25 = vpop.f32.mrb[59].mxu0  ;;  %v1862_v26 = vsel %vm1861_vm9, %v1853_v23, -1e+30 }
 0xa35   : > { %1864 = vmax.xlane.f32.xlu0 %v1862_v26 }
 0xa36   : > { %v1863_v27 = vsel %vm1861_vm9, %v1856_v31, -1e+30 }
 0xa39   : > { %1866 = vmax.xlane.f32.xlu0 %v1863_v27 }
 0xac2   : > { %v1865_v28 = vpop.xlane.xlu0 %1864 }
 0xac3   : > { %v1868_v16 = vsub.f32 %v1862_v26, %v1865_v28 }
 0xac5   : > { %v1870_v47 = vmul.f32 1.442695, %v1868_v16 }
 0xac6   : > { %v1867_v48 = vpop.xlane.xlu0 %1866 }
 0xac7   : > { %2603 = vpow2.f32 %v1870_v47  ;;  %v1869_v57 = vsub.f32 %v1863_v27, %v1867_v48 }
 0xac9   : > { %v1872_v56 = vmul.f32 1.442695, %v1869_v57 }
 0xacb   : > { %2605 = vpow2.f32 %v1872_v56 }
 0xad1   : > { %v2604_v49 = vpop.eup %2603 }
 0xad2   : > { %1874 = vadd.xlane.f32.xlu1 %v2604_v49 }
 0xad5   : > { %v2606_v50 = vpop.eup %2605 }
 0xad6   : > { %1876 = vadd.xlane.f32.xlu1 %v2606_v50 }
 0xb5f   : > { %v1875_v51 = vpop.xlane.xlu1 %1874 }
 0xb60   : > { %2607 = vrcp.f32 %v1875_v51 }
 0xb63   : > { %v1877_v52 = vpop.xlane.xlu1 %1876 }
 0xb64   : > { %2609 = vrcp.f32 %v1877_v52 }
 0xb6a   : > { %v2608_v53 = vpop.eup %2607 }
 0xb6b   : > { %v1880_v32 = vmul.f32 %v2608_v53, %v2604_v49 }
 0xb6d   : > { %1882 = vst [vmem:[%s252_s23] sm:$0xff] %v1880_v32 }
 0xb6e   : > { %v2610_v34 = vpop.eup %2609 }
 0xb6f   : > { %v1881_v35 = vmul.f32 %v2610_v34, %v2606_v50 }
 0xb71   : > { %1883 = vst [vmem:[%s252_s23 + $0x8] sm:$0xff] %v1881_v35 }
 0xb72 PF: > { %s15_s15 = sadd.s32 1, %s2649_s15  }
 0xb73   : > { %p12_p3 = scmp.ge.s32.totalorder %s15_s15, 4  }
 0xb75   :  { %14 = sbr.rel (!%p12_p3) target bundleno = 1 (0x1), region = 77 }
 0xb7c   :  { %1905 = vsyncpa [#allocation3], 1 }
 0xb7d   :  { %1907 = vsyncpa [#allocation3 + $0x1], 1 }

</bundles_post_ra>
